<compile_context>
chip_gen: v6e
topology: v6e:2x2x1
jax: 0.10.0
libtpu: 0.0.40
codegen_flags: <defaults>
</compile_context>

<pallas_src>
import functools

import jax
import jax.numpy as jnp
from jax import lax
from jax.experimental import pallas as pl
from jax.experimental.pallas import tpu as pltpu

# ---------------- model hyper-params (static) ----------------
N_IN_OUT_CHANNELS = 32      # n_in_out_channels
N_HEADS = 4                 # n_heads
D_HEAD = 8                  # n_hidden_every_head_channels  (32 / 4, as in the paper)
HAVE_LOOK_AHEAD_MASK = True
HAVE_VALID_LEN_MASK = True
DROPOUT_RATIO = 0.0
# TODO(synk): dropout is only implemented for eval / p=0.0 (identity); training-mode
#             stochastic dropout of the attention weights is not implemented.

BATCH = 2
SEQ = 8


def _mha_kernel(valid_len_ref,
                xq_ref, xk_ref, xv_ref,
                wq_ref, bq_ref, wk_ref, bk_ref, wv_ref, bv_ref,
                wo_ref, bo_ref,
                out_ref,
                *, batch, seq, n_heads, d_head, look_ahead, valid_len_mask):
    """Single grid step handles ALL batches and heads (tiny problem size)."""
    xq = xq_ref[...]                        # (B*S, C)
    xk = xk_ref[...]
    xv = xv_ref[...]
    bo = bo_ref[...]                        # (1, C)
    n_out = bo.shape[-1]

    inv_sqrt_d = 1.0 / float(d_head) ** 0.5
    neg = jnp.finfo(jnp.float32).min

    # ---- head-invariant combined mask, built ONCE: (B, S, S) bool ----
    mask = None
    if look_ahead or valid_len_mask:
        row3 = lax.broadcasted_iota(jnp.int32, (batch, seq, seq), 1)
        col3 = lax.broadcasted_iota(jnp.int32, (batch, seq, seq), 2)
        if look_ahead:
            mask = col3 > row3
        if valid_len_mask:
            b_ids = lax.broadcasted_iota(jnp.int32, (batch, seq, seq), 0)
            vl_full = jnp.zeros((batch, seq, seq), jnp.int32)
            for b in range(batch):                        # static unroll, B=2
                vl_full = jnp.where(b_ids == b, valid_len_ref[b], vl_full)
            vlm = col3 >= vl_full
            mask = vlm if mask is None else (mask | vlm)

    # Output accumulator initialized with the bias (added exactly once).
    out_acc = jnp.broadcast_to(bo, (batch * seq, n_out)).astype(jnp.float32)

    for h in range(n_heads):                              # static unroll, H=4
        # Per-head projections over all B*S rows; per-head weight slabs mean the
        # computed q/k/v never get sliced along the lane axis.
        qh = (jnp.dot(xq, wq_ref[h], preferred_element_type=jnp.float32)
              + bq_ref[h]) * inv_sqrt_d                   # fold 1/sqrt(D) into q once
        kh = jnp.dot(xk, wk_ref[h], preferred_element_type=jnp.float32) + bk_ref[h]
        vh = jnp.dot(xv, wv_ref[h], preferred_element_type=jnp.float32) + bv_ref[h]

        # (B*S, D) -> (B, S, D): splits the sublane dim on a tile boundary (cheap).
        qh = qh.reshape(batch, seq, d_head)
        kh = kh.reshape(batch, seq, d_head)
        vh = vh.reshape(batch, seq, d_head)

        # Batched q @ k^T over all batches at once (no explicit transpose).
        scores = jnp.einsum('bqd,bkd->bqk', qh, kh,
                            preferred_element_type=jnp.float32)   # (B, S, S)
        if mask is not None:
            scores = jnp.where(mask, neg, scores)

        # Softmax over keys (reciprocal on the EUP slot).
        m = jnp.max(scores, axis=-1, keepdims=True)
        e = jnp.exp(scores - m)
        w = e * pl.reciprocal(jnp.sum(e, axis=-1, keepdims=True), approx=True)

        o_h = jnp.einsum('bqk,bkd->bqd', w, vh,
                         preferred_element_type=jnp.float32)      # (B, S, D)
        # Per-head output-projection accumulation (block-row split of wo, no lane concat).
        out_acc = out_acc + jnp.dot(o_h.reshape(batch * seq, d_head), wo_ref[h],
                                    preferred_element_type=jnp.float32)   # (B*S, C)

    out_ref[...] = out_acc.astype(out_ref.dtype)          # single full-block store


def multi_head_attention(xq, xk, xv, valid_len, params):
    """xq/xk/xv: (B, S, C) float32, valid_len: (B,) int32."""
    B, S, C = xq.shape
    H, D = N_HEADS, D_HEAD

    # Fold batch into matmul rows; pre-split weights into per-head slabs.
    xq2 = xq.reshape(B * S, C)
    xk2 = xk.reshape(B * S, C)
    xv2 = xv.reshape(B * S, C)
    wq_h = params["wq"].reshape(C, H, D).transpose(1, 0, 2)   # (H, C, D)
    wk_h = params["wk"].reshape(C, H, D).transpose(1, 0, 2)
    wv_h = params["wv"].reshape(C, H, D).transpose(1, 0, 2)
    bq_h = params["bq"].reshape(H, 1, D)                      # (H, 1, D)
    bk_h = params["bk"].reshape(H, 1, D)
    bv_h = params["bv"].reshape(H, 1, D)
    wo_h = params["wo"].reshape(H, D, C)                      # (H, D, C)
    bo = params["bo"]                                         # (1, C)

    kernel = functools.partial(
        _mha_kernel, batch=B, seq=S, n_heads=H, d_head=D,
        look_ahead=HAVE_LOOK_AHEAD_MASK, valid_len_mask=HAVE_VALID_LEN_MASK)

    full2 = lambda *_: (0, 0)
    full3 = lambda *_: (0, 0, 0)
    act_spec = pl.BlockSpec((B * S, C), full2)
    w_spec = pl.BlockSpec((H, C, D), full3)
    b_spec = pl.BlockSpec((H, 1, D), full3)
    wo_spec = pl.BlockSpec((H, D, C), full3)
    bo_spec = pl.BlockSpec((1, C), full2)

    grid_spec = pltpu.PrefetchScalarGridSpec(
        num_scalar_prefetch=1,
        grid=(1,),                                    # collapsed batch grid
        in_specs=[act_spec, act_spec, act_spec,
                  w_spec, b_spec,
                  w_spec, b_spec,
                  w_spec, b_spec,
                  wo_spec, bo_spec],
        out_specs=pl.BlockSpec((B * S, C), full2),
    )

    out = pl.pallas_call(
        kernel,
        out_shape=jax.ShapeDtypeStruct((B * S, C), jnp.float32),
        grid_spec=grid_spec,
        compiler_params=pltpu.CompilerParams(dimension_semantics=("arbitrary",)),
    )(valid_len, xq2, xk2, xv2,
      wq_h, bq_h, wk_h, bk_h, wv_h, bv_h, wo_h, bo)
    return out.reshape(B, S, C)


def _reference(xq, xk, xv, valid_len, params):
    """Plain-JAX reference mirroring the PyTorch forward, for sanity checking."""
    B, S, C = xq.shape

    def proj(x, w, b):
        y = x @ w + b[0]                                   # (B, S, H*D)
        return y.reshape(B, S, N_HEADS, D_HEAD).transpose(0, 2, 1, 3)   # (B, H, S, D)

    q = proj(xq, params["wq"], params["bq"])
    k = proj(xk, params["wk"], params["bk"])
    v = proj(xv, params["wv"], params["bv"])
    scores = jnp.einsum("bhqd,bhkd->bhqk", q, k) / jnp.sqrt(jnp.float32(D_HEAD))
    neg = jnp.finfo(jnp.float32).min
    row = jnp.arange(S)[:, None]
    col = jnp.arange(S)[None, :]
    if HAVE_LOOK_AHEAD_MASK:
        scores = jnp.where((col > row)[None, None, :, :], neg, scores)
    if HAVE_VALID_LEN_MASK:
        key_ids = jnp.arange(S)[None, None, None, :]        # (1,1,1,S)
        vlm = key_ids >= valid_len[:, None, None, None]     # (B,1,1,S)
        scores = jnp.where(vlm, neg, scores)
    w = jax.nn.softmax(scores, axis=-1)
    o = jnp.einsum("bhqk,bhkd->bhqd", w, v)                 # (B, H, S, D)
    o = o.transpose(0, 2, 1, 3).reshape(B, S, N_HEADS * D_HEAD)
    return o @ params["wo"] + params["bo"][0]


def init_params(key):
    HD = N_HEADS * D_HEAD
    ks = jax.random.split(key, 8)

    # nn.Linear-style uniform(-1/sqrt(fan_in), 1/sqrt(fan_in)), deterministic via PRNGKey
    def lin(kw, kb, fan_in, fan_out):
        bound = 1.0 / jnp.sqrt(jnp.float32(fan_in))
        w = jax.random.uniform(kw, (fan_in, fan_out), jnp.float32, -bound, bound)
        b = jax.random.uniform(kb, (1, fan_out), jnp.float32, -bound, bound)
        return w, b

    wq, bq = lin(ks[0], ks[1], N_IN_OUT_CHANNELS, HD)
    wk, bk = lin(ks[2], ks[3], N_IN_OUT_CHANNELS, HD)
    wv, bv = lin(ks[4], ks[5], N_IN_OUT_CHANNELS, HD)
    wo, bo = lin(ks[6], ks[7], HD, N_IN_OUT_CHANNELS)
    return dict(wq=wq, bq=bq, wk=wk, bk=bk, wv=wv, bv=bv, wo=wo, bo=bo)


if __name__ == "__main__":
    key = jax.random.PRNGKey(0)
    k_p, k_q, k_k, k_v = jax.random.split(key, 4)

    params = init_params(k_p)
    xq = jax.random.normal(k_q, (BATCH, SEQ, N_IN_OUT_CHANNELS), jnp.float32)
    xk = jax.random.normal(k_k, (BATCH, SEQ, N_IN_OUT_CHANNELS), jnp.float32)
    xv = jax.random.normal(k_v, (BATCH, SEQ, N_IN_OUT_CHANNELS), jnp.float32)
    valid_len = jnp.array([5, 8], dtype=jnp.int32)

    out = multi_head_attention(xq, xk, xv, valid_len, params)
    out = jax.block_until_ready(out)

    ref = _reference(xq, xk, xv, valid_len, params)
    assert out.shape == (BATCH, SEQ, N_IN_OUT_CHANNELS)
    # tolerance accounts for approx-reciprocal softmax denominator + MXU rounding
    assert jnp.allclose(out, ref, atol=2e-3, rtol=2e-3), \
        f"max abs diff {jnp.max(jnp.abs(out - ref))}"

    print("KERNEL_OK")
</pallas_src>

<mosaic_0001>
module attributes {stable_mosaic.version = 11 : i64} {
  func.func @_mha_kernel(%arg0: i32, %arg1: memref<2xi32, #tpu.memory_space<smem>>, %arg2: memref<16x32xf32, #tpu.memory_space<vmem>>, %arg3: memref<16x32xf32, #tpu.memory_space<vmem>>, %arg4: memref<16x32xf32, #tpu.memory_space<vmem>>, %arg5: memref<4x32x8xf32, #tpu.memory_space<vmem>>, %arg6: memref<4x1x8xf32, #tpu.memory_space<vmem>>, %arg7: memref<4x32x8xf32, #tpu.memory_space<vmem>>, %arg8: memref<4x1x8xf32, #tpu.memory_space<vmem>>, %arg9: memref<4x32x8xf32, #tpu.memory_space<vmem>>, %arg10: memref<4x1x8xf32, #tpu.memory_space<vmem>>, %arg11: memref<4x8x32xf32, #tpu.memory_space<vmem>>, %arg12: memref<1x32xf32, #tpu.memory_space<vmem>>, %arg13: memref<16x32xf32, #tpu.memory_space<vmem>>) attributes {dimension_semantics = [#tpu.dimension_semantics<arbitrary>], iteration_bounds = array<i64: 1>, scalar_prefetch = 1 : i64, scratch_operands = 0 : i64, tpu.core_type = #tpu.core_type<tc>, window_params = [{pipeline_mode = #tpu.pipeline_mode<synchronous>, transform_indices = @transform_0, window_bounds = array<i64: 16, 32>}, {pipeline_mode = #tpu.pipeline_mode<synchronous>, transform_indices = @transform_1, window_bounds = array<i64: 16, 32>}, {pipeline_mode = #tpu.pipeline_mode<synchronous>, transform_indices = @transform_2, window_bounds = array<i64: 16, 32>}, {pipeline_mode = #tpu.pipeline_mode<synchronous>, transform_indices = @transform_3, window_bounds = array<i64: 4, 32, 8>}, {pipeline_mode = #tpu.pipeline_mode<synchronous>, transform_indices = @transform_4, window_bounds = array<i64: 4, 1, 8>}, {pipeline_mode = #tpu.pipeline_mode<synchronous>, transform_indices = @transform_5, window_bounds = array<i64: 4, 32, 8>}, {pipeline_mode = #tpu.pipeline_mode<synchronous>, transform_indices = @transform_6, window_bounds = array<i64: 4, 1, 8>}, {pipeline_mode = #tpu.pipeline_mode<synchronous>, transform_indices = @transform_7, window_bounds = array<i64: 4, 32, 8>}, {pipeline_mode = #tpu.pipeline_mode<synchronous>, transform_indices = @transform_8, window_bounds = array<i64: 4, 1, 8>}, {pipeline_mode = #tpu.pipeline_mode<synchronous>, transform_indices = @transform_9, window_bounds = array<i64: 4, 8, 32>}, {pipeline_mode = #tpu.pipeline_mode<synchronous>, transform_indices = @transform_10, window_bounds = array<i64: 1, 32>}, {pipeline_mode = #tpu.pipeline_mode<synchronous>, transform_indices = @transform_11, window_bounds = array<i64: 16, 32>}]} {
    %c0 = arith.constant 0 : index
    %c0_0 = arith.constant 0 : index
    %0 = vector.load %arg2[%c0, %c0_0] : memref<16x32xf32, #tpu.memory_space<vmem>>, vector<16x32xf32>
    %c0_1 = arith.constant 0 : index
    %c0_2 = arith.constant 0 : index
    %1 = vector.load %arg3[%c0_1, %c0_2] : memref<16x32xf32, #tpu.memory_space<vmem>>, vector<16x32xf32>
    %c0_3 = arith.constant 0 : index
    %c0_4 = arith.constant 0 : index
    %2 = vector.load %arg4[%c0_3, %c0_4] : memref<16x32xf32, #tpu.memory_space<vmem>>, vector<16x32xf32>
    %c0_5 = arith.constant 0 : index
    %c0_6 = arith.constant 0 : index
    %3 = vector.load %arg12[%c0_5, %c0_6] : memref<1x32xf32, #tpu.memory_space<vmem>>, vector<1x32xf32>
    %4 = tpu.iota {dimensions = array<i32: 1>} : vector<2x8x8xi32>
    %5 = tpu.iota {dimensions = array<i32: 2>} : vector<2x8x8xi32>
    %6 = arith.cmpi sgt, %5, %4 : vector<2x8x8xi32>
    %7 = tpu.iota {dimensions = array<i32: 0>} : vector<2x8x8xi32>
    %c0_i32 = arith.constant 0 : i32
    %8 = vector.broadcast %c0_i32 : i32 to vector<2x8x8xi32>
    %c0_i32_7 = arith.constant 0 : i32
    %9 = vector.broadcast %c0_i32_7 : i32 to vector<2x8x8xi32>
    %10 = arith.cmpi eq, %7, %9 : vector<2x8x8xi32>
    %c0_8 = arith.constant 0 : index
    %11 = memref.load %arg1[%c0_8] : memref<2xi32, #tpu.memory_space<smem>>
    %12 = vector.broadcast %11 : i32 to vector<2x8x8xi32>
    %13 = arith.select %10, %12, %8 : vector<2x8x8xi1>, vector<2x8x8xi32>
    %c1_i32 = arith.constant 1 : i32
    %14 = vector.broadcast %c1_i32 : i32 to vector<2x8x8xi32>
    %15 = arith.cmpi eq, %7, %14 : vector<2x8x8xi32>
    %c1 = arith.constant 1 : index
    %16 = memref.load %arg1[%c1] : memref<2xi32, #tpu.memory_space<smem>>
    %17 = vector.broadcast %16 : i32 to vector<2x8x8xi32>
    %18 = arith.select %15, %17, %13 : vector<2x8x8xi1>, vector<2x8x8xi32>
    %19 = arith.cmpi sge, %5, %18 : vector<2x8x8xi32>
    %20 = arith.ori %6, %19 : vector<2x8x8xi1>
    %21 = vector.shape_cast %3 : vector<1x32xf32> to vector<1x32xf32>
    %22 = vector.broadcast %21 : vector<1x32xf32> to vector<16x32xf32>
    %c0_9 = arith.constant 0 : index
    %c0_10 = arith.constant 0 : index
    %c0_11 = arith.constant 0 : index
    %23 = vector.load %arg5[%c0_9, %c0_10, %c0_11] : memref<4x32x8xf32, #tpu.memory_space<vmem>>, vector<1x32x8xf32>
    %24 = vector.shape_cast %23 : vector<1x32x8xf32> to vector<32x8xf32>
    %cst = arith.constant dense<0.000000e+00> : vector<16x8xf32>
    %25 = tpu.matmul %0, %24, %cst {dimension_numbers = #tpu.dot_dimension_numbers<[1], [0], [0], [1], [0, 0, 1, 1], [], []>} : vector<16x32xf32>, vector<32x8xf32>, vector<16x8xf32> -> vector<16x8xf32>
    %c0_12 = arith.constant 0 : index
    %c0_13 = arith.constant 0 : index
    %c0_14 = arith.constant 0 : index
    %26 = vector.load %arg6[%c0_12, %c0_13, %c0_14] : memref<4x1x8xf32, #tpu.memory_space<vmem>>, vector<1x1x8xf32>
    %27 = vector.shape_cast %26 : vector<1x1x8xf32> to vector<1x8xf32>
    %28 = vector.broadcast %27 : vector<1x8xf32> to vector<16x8xf32>
    %29 = arith.addf %25, %28 : vector<16x8xf32>
    %cst_15 = arith.constant 0.353553385 : f32
    %30 = vector.broadcast %cst_15 : f32 to vector<16x8xf32>
    %31 = arith.mulf %29, %30 : vector<16x8xf32>
    %c0_16 = arith.constant 0 : index
    %c0_17 = arith.constant 0 : index
    %c0_18 = arith.constant 0 : index
    %32 = vector.load %arg7[%c0_16, %c0_17, %c0_18] : memref<4x32x8xf32, #tpu.memory_space<vmem>>, vector<1x32x8xf32>
    %33 = vector.shape_cast %32 : vector<1x32x8xf32> to vector<32x8xf32>
    %cst_19 = arith.constant dense<0.000000e+00> : vector<16x8xf32>
    %34 = tpu.matmul %1, %33, %cst_19 {dimension_numbers = #tpu.dot_dimension_numbers<[1], [0], [0], [1], [0, 0, 1, 1], [], []>} : vector<16x32xf32>, vector<32x8xf32>, vector<16x8xf32> -> vector<16x8xf32>
    %c0_20 = arith.constant 0 : index
    %c0_21 = arith.constant 0 : index
    %c0_22 = arith.constant 0 : index
    %35 = vector.load %arg8[%c0_20, %c0_21, %c0_22] : memref<4x1x8xf32, #tpu.memory_space<vmem>>, vector<1x1x8xf32>
    %36 = vector.shape_cast %35 : vector<1x1x8xf32> to vector<1x8xf32>
    %37 = vector.broadcast %36 : vector<1x8xf32> to vector<16x8xf32>
    %38 = arith.addf %34, %37 : vector<16x8xf32>
    %c0_23 = arith.constant 0 : index
    %c0_24 = arith.constant 0 : index
    %c0_25 = arith.constant 0 : index
    %39 = vector.load %arg9[%c0_23, %c0_24, %c0_25] : memref<4x32x8xf32, #tpu.memory_space<vmem>>, vector<1x32x8xf32>
    %40 = vector.shape_cast %39 : vector<1x32x8xf32> to vector<32x8xf32>
    %cst_26 = arith.constant dense<0.000000e+00> : vector<16x8xf32>
    %41 = tpu.matmul %2, %40, %cst_26 {dimension_numbers = #tpu.dot_dimension_numbers<[1], [0], [0], [1], [0, 0, 1, 1], [], []>} : vector<16x32xf32>, vector<32x8xf32>, vector<16x8xf32> -> vector<16x8xf32>
    %c0_27 = arith.constant 0 : index
    %c0_28 = arith.constant 0 : index
    %c0_29 = arith.constant 0 : index
    %42 = vector.load %arg10[%c0_27, %c0_28, %c0_29] : memref<4x1x8xf32, #tpu.memory_space<vmem>>, vector<1x1x8xf32>
    %43 = vector.shape_cast %42 : vector<1x1x8xf32> to vector<1x8xf32>
    %44 = vector.broadcast %43 : vector<1x8xf32> to vector<16x8xf32>
    %45 = arith.addf %41, %44 : vector<16x8xf32>
    %46 = vector.shape_cast %31 : vector<16x8xf32> to vector<2x8x8xf32>
    %47 = vector.shape_cast %38 : vector<16x8xf32> to vector<2x8x8xf32>
    %48 = vector.shape_cast %45 : vector<16x8xf32> to vector<2x8x8xf32>
    "tpu.trace_start"() <{level = 10 : i32, message = "bqd,bkd->bqk"}> : () -> ()
    %cst_30 = arith.constant dense<0.000000e+00> : vector<2x8x8xf32>
    %49 = tpu.matmul %46, %47, %cst_30 {dimension_numbers = #tpu.dot_dimension_numbers<[2], [2], [1], [1], [0, 0, 0, 1, 1, 1], [0], [0]>} : vector<2x8x8xf32>, vector<2x8x8xf32>, vector<2x8x8xf32> -> vector<2x8x8xf32>
    %cst_31 = arith.constant -3.40282347E+38 : f32
    "tpu.trace_stop"() : () -> ()
    %50 = vector.broadcast %cst_31 : f32 to vector<2x8x8xf32>
    %51 = arith.select %20, %50, %49 : vector<2x8x8xi1>, vector<2x8x8xf32>
    %cst_32 = arith.constant dense<0xFF800000> : vector<2x8xf32>
    %52 = vector.multi_reduction <maximumf>, %51, %cst_32 [2] : vector<2x8x8xf32> to vector<2x8xf32>
    %53 = vector.shape_cast %52 : vector<2x8xf32> to vector<2x8x1xf32>
    %54 = vector.broadcast %53 : vector<2x8x1xf32> to vector<2x8x8xf32>
    %55 = arith.subf %51, %54 : vector<2x8x8xf32>
    %56 = math.exp %55 : vector<2x8x8xf32>
    %cst_33 = arith.constant dense<0.000000e+00> : vector<2x8xf32>
    %57 = vector.multi_reduction <add>, %56, %cst_33 [2] : vector<2x8x8xf32> to vector<2x8xf32>
    %58 = vector.shape_cast %57 : vector<2x8xf32> to vector<2x8x1xf32>
    %59 = tpu.reciprocal %58 {approx = true} : vector<2x8x1xf32> -> vector<2x8x1xf32>
    %60 = vector.broadcast %59 : vector<2x8x1xf32> to vector<2x8x8xf32>
    %61 = arith.mulf %56, %60 : vector<2x8x8xf32>
    "tpu.trace_start"() <{level = 10 : i32, message = "bqk,bkd->bqd"}> : () -> ()
    %cst_34 = arith.constant dense<0.000000e+00> : vector<2x8x8xf32>
    %62 = tpu.matmul %61, %48, %cst_34 {dimension_numbers = #tpu.dot_dimension_numbers<[2], [1], [1], [2], [0, 0, 0, 1, 1, 2], [0], [0]>} : vector<2x8x8xf32>, vector<2x8x8xf32>, vector<2x8x8xf32> -> vector<2x8x8xf32>
    "tpu.trace_stop"() : () -> ()
    %63 = vector.shape_cast %62 : vector<2x8x8xf32> to vector<16x8xf32>
    %c0_35 = arith.constant 0 : index
    %c0_36 = arith.constant 0 : index
    %c0_37 = arith.constant 0 : index
    %64 = vector.load %arg11[%c0_35, %c0_36, %c0_37] : memref<4x8x32xf32, #tpu.memory_space<vmem>>, vector<1x8x32xf32>
    %65 = vector.shape_cast %64 : vector<1x8x32xf32> to vector<8x32xf32>
    %cst_38 = arith.constant dense<0.000000e+00> : vector<16x32xf32>
    %66 = tpu.matmul %63, %65, %cst_38 {dimension_numbers = #tpu.dot_dimension_numbers<[1], [0], [0], [1], [0, 0, 1, 1], [], []>} : vector<16x8xf32>, vector<8x32xf32>, vector<16x32xf32> -> vector<16x32xf32>
    %67 = arith.addf %22, %66 : vector<16x32xf32>
    %c1_39 = arith.constant 1 : index
    %c0_40 = arith.constant 0 : index
    %c0_41 = arith.constant 0 : index
    %68 = vector.load %arg5[%c1_39, %c0_40, %c0_41] : memref<4x32x8xf32, #tpu.memory_space<vmem>>, vector<1x32x8xf32>
    %69 = vector.shape_cast %68 : vector<1x32x8xf32> to vector<32x8xf32>
    %cst_42 = arith.constant dense<0.000000e+00> : vector<16x8xf32>
    %70 = tpu.matmul %0, %69, %cst_42 {dimension_numbers = #tpu.dot_dimension_numbers<[1], [0], [0], [1], [0, 0, 1, 1], [], []>} : vector<16x32xf32>, vector<32x8xf32>, vector<16x8xf32> -> vector<16x8xf32>
    %c1_43 = arith.constant 1 : index
    %c0_44 = arith.constant 0 : index
    %c0_45 = arith.constant 0 : index
    %71 = vector.load %arg6[%c1_43, %c0_44, %c0_45] : memref<4x1x8xf32, #tpu.memory_space<vmem>>, vector<1x1x8xf32>
    %72 = vector.shape_cast %71 : vector<1x1x8xf32> to vector<1x8xf32>
    %73 = vector.broadcast %72 : vector<1x8xf32> to vector<16x8xf32>
    %74 = arith.addf %70, %73 : vector<16x8xf32>
    %cst_46 = arith.constant 0.353553385 : f32
    %75 = vector.broadcast %cst_46 : f32 to vector<16x8xf32>
    %76 = arith.mulf %74, %75 : vector<16x8xf32>
    %c1_47 = arith.constant 1 : index
    %c0_48 = arith.constant 0 : index
    %c0_49 = arith.constant 0 : index
    %77 = vector.load %arg7[%c1_47, %c0_48, %c0_49] : memref<4x32x8xf32, #tpu.memory_space<vmem>>, vector<1x32x8xf32>
    %78 = vector.shape_cast %77 : vector<1x32x8xf32> to vector<32x8xf32>
    %cst_50 = arith.constant dense<0.000000e+00> : vector<16x8xf32>
    %79 = tpu.matmul %1, %78, %cst_50 {dimension_numbers = #tpu.dot_dimension_numbers<[1], [0], [0], [1], [0, 0, 1, 1], [], []>} : vector<16x32xf32>, vector<32x8xf32>, vector<16x8xf32> -> vector<16x8xf32>
    %c1_51 = arith.constant 1 : index
    %c0_52 = arith.constant 0 : index
    %c0_53 = arith.constant 0 : index
    %80 = vector.load %arg8[%c1_51, %c0_52, %c0_53] : memref<4x1x8xf32, #tpu.memory_space<vmem>>, vector<1x1x8xf32>
    %81 = vector.shape_cast %80 : vector<1x1x8xf32> to vector<1x8xf32>
    %82 = vector.broadcast %81 : vector<1x8xf32> to vector<16x8xf32>
    %83 = arith.addf %79, %82 : vector<16x8xf32>
    %c1_54 = arith.constant 1 : index
    %c0_55 = arith.constant 0 : index
    %c0_56 = arith.constant 0 : index
    %84 = vector.load %arg9[%c1_54, %c0_55, %c0_56] : memref<4x32x8xf32, #tpu.memory_space<vmem>>, vector<1x32x8xf32>
    %85 = vector.shape_cast %84 : vector<1x32x8xf32> to vector<32x8xf32>
    %cst_57 = arith.constant dense<0.000000e+00> : vector<16x8xf32>
    %86 = tpu.matmul %2, %85, %cst_57 {dimension_numbers = #tpu.dot_dimension_numbers<[1], [0], [0], [1], [0, 0, 1, 1], [], []>} : vector<16x32xf32>, vector<32x8xf32>, vector<16x8xf32> -> vector<16x8xf32>
    %c1_58 = arith.constant 1 : index
    %c0_59 = arith.constant 0 : index
    %c0_60 = arith.constant 0 : index
    %87 = vector.load %arg10[%c1_58, %c0_59, %c0_60] : memref<4x1x8xf32, #tpu.memory_space<vmem>>, vector<1x1x8xf32>
    %88 = vector.shape_cast %87 : vector<1x1x8xf32> to vector<1x8xf32>
    %89 = vector.broadcast %88 : vector<1x8xf32> to vector<16x8xf32>
    %90 = arith.addf %86, %89 : vector<16x8xf32>
    %91 = vector.shape_cast %76 : vector<16x8xf32> to vector<2x8x8xf32>
    %92 = vector.shape_cast %83 : vector<16x8xf32> to vector<2x8x8xf32>
    %93 = vector.shape_cast %90 : vector<16x8xf32> to vector<2x8x8xf32>
    "tpu.trace_start"() <{level = 10 : i32, message = "bqd,bkd->bqk"}> : () -> ()
    %cst_61 = arith.constant dense<0.000000e+00> : vector<2x8x8xf32>
    %94 = tpu.matmul %91, %92, %cst_61 {dimension_numbers = #tpu.dot_dimension_numbers<[2], [2], [1], [1], [0, 0, 0, 1, 1, 1], [0], [0]>} : vector<2x8x8xf32>, vector<2x8x8xf32>, vector<2x8x8xf32> -> vector<2x8x8xf32>
    %cst_62 = arith.constant -3.40282347E+38 : f32
    "tpu.trace_stop"() : () -> ()
    %95 = vector.broadcast %cst_62 : f32 to vector<2x8x8xf32>
    %96 = arith.select %20, %95, %94 : vector<2x8x8xi1>, vector<2x8x8xf32>
    %cst_63 = arith.constant dense<0xFF800000> : vector<2x8xf32>
    %97 = vector.multi_reduction <maximumf>, %96, %cst_63 [2] : vector<2x8x8xf32> to vector<2x8xf32>
    %98 = vector.shape_cast %97 : vector<2x8xf32> to vector<2x8x1xf32>
    %99 = vector.broadcast %98 : vector<2x8x1xf32> to vector<2x8x8xf32>
    %100 = arith.subf %96, %99 : vector<2x8x8xf32>
    %101 = math.exp %100 : vector<2x8x8xf32>
    %cst_64 = arith.constant dense<0.000000e+00> : vector<2x8xf32>
    %102 = vector.multi_reduction <add>, %101, %cst_64 [2] : vector<2x8x8xf32> to vector<2x8xf32>
    %103 = vector.shape_cast %102 : vector<2x8xf32> to vector<2x8x1xf32>
    %104 = tpu.reciprocal %103 {approx = true} : vector<2x8x1xf32> -> vector<2x8x1xf32>
    %105 = vector.broadcast %104 : vector<2x8x1xf32> to vector<2x8x8xf32>
    %106 = arith.mulf %101, %105 : vector<2x8x8xf32>
    "tpu.trace_start"() <{level = 10 : i32, message = "bqk,bkd->bqd"}> : () -> ()
    %cst_65 = arith.constant dense<0.000000e+00> : vector<2x8x8xf32>
    %107 = tpu.matmul %106, %93, %cst_65 {dimension_numbers = #tpu.dot_dimension_numbers<[2], [1], [1], [2], [0, 0, 0, 1, 1, 2], [0], [0]>} : vector<2x8x8xf32>, vector<2x8x8xf32>, vector<2x8x8xf32> -> vector<2x8x8xf32>
    "tpu.trace_stop"() : () -> ()
    %108 = vector.shape_cast %107 : vector<2x8x8xf32> to vector<16x8xf32>
    %c1_66 = arith.constant 1 : index
    %c0_67 = arith.constant 0 : index
    %c0_68 = arith.constant 0 : index
    %109 = vector.load %arg11[%c1_66, %c0_67, %c0_68] : memref<4x8x32xf32, #tpu.memory_space<vmem>>, vector<1x8x32xf32>
    %110 = vector.shape_cast %109 : vector<1x8x32xf32> to vector<8x32xf32>
    %cst_69 = arith.constant dense<0.000000e+00> : vector<16x32xf32>
    %111 = tpu.matmul %108, %110, %cst_69 {dimension_numbers = #tpu.dot_dimension_numbers<[1], [0], [0], [1], [0, 0, 1, 1], [], []>} : vector<16x8xf32>, vector<8x32xf32>, vector<16x32xf32> -> vector<16x32xf32>
    %112 = arith.addf %67, %111 : vector<16x32xf32>
    %c2 = arith.constant 2 : index
    %c0_70 = arith.constant 0 : index
    %c0_71 = arith.constant 0 : index
    %113 = vector.load %arg5[%c2, %c0_70, %c0_71] : memref<4x32x8xf32, #tpu.memory_space<vmem>>, vector<1x32x8xf32>
    %114 = vector.shape_cast %113 : vector<1x32x8xf32> to vector<32x8xf32>
    %cst_72 = arith.constant dense<0.000000e+00> : vector<16x8xf32>
    %115 = tpu.matmul %0, %114, %cst_72 {dimension_numbers = #tpu.dot_dimension_numbers<[1], [0], [0], [1], [0, 0, 1, 1], [], []>} : vector<16x32xf32>, vector<32x8xf32>, vector<16x8xf32> -> vector<16x8xf32>
    %c2_73 = arith.constant 2 : index
    %c0_74 = arith.constant 0 : index
    %c0_75 = arith.constant 0 : index
    %116 = vector.load %arg6[%c2_73, %c0_74, %c0_75] : memref<4x1x8xf32, #tpu.memory_space<vmem>>, vector<1x1x8xf32>
    %117 = vector.shape_cast %116 : vector<1x1x8xf32> to vector<1x8xf32>
    %118 = vector.broadcast %117 : vector<1x8xf32> to vector<16x8xf32>
    %119 = arith.addf %115, %118 : vector<16x8xf32>
    %cst_76 = arith.constant 0.353553385 : f32
    %120 = vector.broadcast %cst_76 : f32 to vector<16x8xf32>
    %121 = arith.mulf %119, %120 : vector<16x8xf32>
    %c2_77 = arith.constant 2 : index
    %c0_78 = arith.constant 0 : index
    %c0_79 = arith.constant 0 : index
    %122 = vector.load %arg7[%c2_77, %c0_78, %c0_79] : memref<4x32x8xf32, #tpu.memory_space<vmem>>, vector<1x32x8xf32>
    %123 = vector.shape_cast %122 : vector<1x32x8xf32> to vector<32x8xf32>
    %cst_80 = arith.constant dense<0.000000e+00> : vector<16x8xf32>
    %124 = tpu.matmul %1, %123, %cst_80 {dimension_numbers = #tpu.dot_dimension_numbers<[1], [0], [0], [1], [0, 0, 1, 1], [], []>} : vector<16x32xf32>, vector<32x8xf32>, vector<16x8xf32> -> vector<16x8xf32>
    %c2_81 = arith.constant 2 : index
    %c0_82 = arith.constant 0 : index
    %c0_83 = arith.constant 0 : index
    %125 = vector.load %arg8[%c2_81, %c0_82, %c0_83] : memref<4x1x8xf32, #tpu.memory_space<vmem>>, vector<1x1x8xf32>
    %126 = vector.shape_cast %125 : vector<1x1x8xf32> to vector<1x8xf32>
    %127 = vector.broadcast %126 : vector<1x8xf32> to vector<16x8xf32>
    %128 = arith.addf %124, %127 : vector<16x8xf32>
    %c2_84 = arith.constant 2 : index
    %c0_85 = arith.constant 0 : index
    %c0_86 = arith.constant 0 : index
    %129 = vector.load %arg9[%c2_84, %c0_85, %c0_86] : memref<4x32x8xf32, #tpu.memory_space<vmem>>, vector<1x32x8xf32>
    %130 = vector.shape_cast %129 : vector<1x32x8xf32> to vector<32x8xf32>
    %cst_87 = arith.constant dense<0.000000e+00> : vector<16x8xf32>
    %131 = tpu.matmul %2, %130, %cst_87 {dimension_numbers = #tpu.dot_dimension_numbers<[1], [0], [0], [1], [0, 0, 1, 1], [], []>} : vector<16x32xf32>, vector<32x8xf32>, vector<16x8xf32> -> vector<16x8xf32>
    %c2_88 = arith.constant 2 : index
    %c0_89 = arith.constant 0 : index
    %c0_90 = arith.constant 0 : index
    %132 = vector.load %arg10[%c2_88, %c0_89, %c0_90] : memref<4x1x8xf32, #tpu.memory_space<vmem>>, vector<1x1x8xf32>
    %133 = vector.shape_cast %132 : vector<1x1x8xf32> to vector<1x8xf32>
    %134 = vector.broadcast %133 : vector<1x8xf32> to vector<16x8xf32>
    %135 = arith.addf %131, %134 : vector<16x8xf32>
    %136 = vector.shape_cast %121 : vector<16x8xf32> to vector<2x8x8xf32>
    %137 = vector.shape_cast %128 : vector<16x8xf32> to vector<2x8x8xf32>
    %138 = vector.shape_cast %135 : vector<16x8xf32> to vector<2x8x8xf32>
    "tpu.trace_start"() <{level = 10 : i32, message = "bqd,bkd->bqk"}> : () -> ()
    %cst_91 = arith.constant dense<0.000000e+00> : vector<2x8x8xf32>
    %139 = tpu.matmul %136, %137, %cst_91 {dimension_numbers = #tpu.dot_dimension_numbers<[2], [2], [1], [1], [0, 0, 0, 1, 1, 1], [0], [0]>} : vector<2x8x8xf32>, vector<2x8x8xf32>, vector<2x8x8xf32> -> vector<2x8x8xf32>
    %cst_92 = arith.constant -3.40282347E+38 : f32
    "tpu.trace_stop"() : () -> ()
    %140 = vector.broadcast %cst_92 : f32 to vector<2x8x8xf32>
    %141 = arith.select %20, %140, %139 : vector<2x8x8xi1>, vector<2x8x8xf32>
    %cst_93 = arith.constant dense<0xFF800000> : vector<2x8xf32>
    %142 = vector.multi_reduction <maximumf>, %141, %cst_93 [2] : vector<2x8x8xf32> to vector<2x8xf32>
    %143 = vector.shape_cast %142 : vector<2x8xf32> to vector<2x8x1xf32>
    %144 = vector.broadcast %143 : vector<2x8x1xf32> to vector<2x8x8xf32>
    %145 = arith.subf %141, %144 : vector<2x8x8xf32>
    %146 = math.exp %145 : vector<2x8x8xf32>
    %cst_94 = arith.constant dense<0.000000e+00> : vector<2x8xf32>
    %147 = vector.multi_reduction <add>, %146, %cst_94 [2] : vector<2x8x8xf32> to vector<2x8xf32>
    %148 = vector.shape_cast %147 : vector<2x8xf32> to vector<2x8x1xf32>
    %149 = tpu.reciprocal %148 {approx = true} : vector<2x8x1xf32> -> vector<2x8x1xf32>
    %150 = vector.broadcast %149 : vector<2x8x1xf32> to vector<2x8x8xf32>
    %151 = arith.mulf %146, %150 : vector<2x8x8xf32>
    "tpu.trace_start"() <{level = 10 : i32, message = "bqk,bkd->bqd"}> : () -> ()
    %cst_95 = arith.constant dense<0.000000e+00> : vector<2x8x8xf32>
    %152 = tpu.matmul %151, %138, %cst_95 {dimension_numbers = #tpu.dot_dimension_numbers<[2], [1], [1], [2], [0, 0, 0, 1, 1, 2], [0], [0]>} : vector<2x8x8xf32>, vector<2x8x8xf32>, vector<2x8x8xf32> -> vector<2x8x8xf32>
    "tpu.trace_stop"() : () -> ()
    %153 = vector.shape_cast %152 : vector<2x8x8xf32> to vector<16x8xf32>
    %c2_96 = arith.constant 2 : index
    %c0_97 = arith.constant 0 : index
    %c0_98 = arith.constant 0 : index
    %154 = vector.load %arg11[%c2_96, %c0_97, %c0_98] : memref<4x8x32xf32, #tpu.memory_space<vmem>>, vector<1x8x32xf32>
    %155 = vector.shape_cast %154 : vector<1x8x32xf32> to vector<8x32xf32>
    %cst_99 = arith.constant dense<0.000000e+00> : vector<16x32xf32>
    %156 = tpu.matmul %153, %155, %cst_99 {dimension_numbers = #tpu.dot_dimension_numbers<[1], [0], [0], [1], [0, 0, 1, 1], [], []>} : vector<16x8xf32>, vector<8x32xf32>, vector<16x32xf32> -> vector<16x32xf32>
    %157 = arith.addf %112, %156 : vector<16x32xf32>
    %c3 = arith.constant 3 : index
    %c0_100 = arith.constant 0 : index
    %c0_101 = arith.constant 0 : index
    %158 = vector.load %arg5[%c3, %c0_100, %c0_101] : memref<4x32x8xf32, #tpu.memory_space<vmem>>, vector<1x32x8xf32>
    %159 = vector.shape_cast %158 : vector<1x32x8xf32> to vector<32x8xf32>
    %cst_102 = arith.constant dense<0.000000e+00> : vector<16x8xf32>
    %160 = tpu.matmul %0, %159, %cst_102 {dimension_numbers = #tpu.dot_dimension_numbers<[1], [0], [0], [1], [0, 0, 1, 1], [], []>} : vector<16x32xf32>, vector<32x8xf32>, vector<16x8xf32> -> vector<16x8xf32>
    %c3_103 = arith.constant 3 : index
    %c0_104 = arith.constant 0 : index
    %c0_105 = arith.constant 0 : index
    %161 = vector.load %arg6[%c3_103, %c0_104, %c0_105] : memref<4x1x8xf32, #tpu.memory_space<vmem>>, vector<1x1x8xf32>
    %162 = vector.shape_cast %161 : vector<1x1x8xf32> to vector<1x8xf32>
    %163 = vector.broadcast %162 : vector<1x8xf32> to vector<16x8xf32>
    %164 = arith.addf %160, %163 : vector<16x8xf32>
    %cst_106 = arith.constant 0.353553385 : f32
    %165 = vector.broadcast %cst_106 : f32 to vector<16x8xf32>
    %166 = arith.mulf %164, %165 : vector<16x8xf32>
    %c3_107 = arith.constant 3 : index
    %c0_108 = arith.constant 0 : index
    %c0_109 = arith.constant 0 : index
    %167 = vector.load %arg7[%c3_107, %c0_108, %c0_109] : memref<4x32x8xf32, #tpu.memory_space<vmem>>, vector<1x32x8xf32>
    %168 = vector.shape_cast %167 : vector<1x32x8xf32> to vector<32x8xf32>
    %cst_110 = arith.constant dense<0.000000e+00> : vector<16x8xf32>
    %169 = tpu.matmul %1, %168, %cst_110 {dimension_numbers = #tpu.dot_dimension_numbers<[1], [0], [0], [1], [0, 0, 1, 1], [], []>} : vector<16x32xf32>, vector<32x8xf32>, vector<16x8xf32> -> vector<16x8xf32>
    %c3_111 = arith.constant 3 : index
    %c0_112 = arith.constant 0 : index
    %c0_113 = arith.constant 0 : index
    %170 = vector.load %arg8[%c3_111, %c0_112, %c0_113] : memref<4x1x8xf32, #tpu.memory_space<vmem>>, vector<1x1x8xf32>
    %171 = vector.shape_cast %170 : vector<1x1x8xf32> to vector<1x8xf32>
    %172 = vector.broadcast %171 : vector<1x8xf32> to vector<16x8xf32>
    %173 = arith.addf %169, %172 : vector<16x8xf32>
    %c3_114 = arith.constant 3 : index
    %c0_115 = arith.constant 0 : index
    %c0_116 = arith.constant 0 : index
    %174 = vector.load %arg9[%c3_114, %c0_115, %c0_116] : memref<4x32x8xf32, #tpu.memory_space<vmem>>, vector<1x32x8xf32>
    %175 = vector.shape_cast %174 : vector<1x32x8xf32> to vector<32x8xf32>
    %cst_117 = arith.constant dense<0.000000e+00> : vector<16x8xf32>
    %176 = tpu.matmul %2, %175, %cst_117 {dimension_numbers = #tpu.dot_dimension_numbers<[1], [0], [0], [1], [0, 0, 1, 1], [], []>} : vector<16x32xf32>, vector<32x8xf32>, vector<16x8xf32> -> vector<16x8xf32>
    %c3_118 = arith.constant 3 : index
    %c0_119 = arith.constant 0 : index
    %c0_120 = arith.constant 0 : index
    %177 = vector.load %arg10[%c3_118, %c0_119, %c0_120] : memref<4x1x8xf32, #tpu.memory_space<vmem>>, vector<1x1x8xf32>
    %178 = vector.shape_cast %177 : vector<1x1x8xf32> to vector<1x8xf32>
    %179 = vector.broadcast %178 : vector<1x8xf32> to vector<16x8xf32>
    %180 = arith.addf %176, %179 : vector<16x8xf32>
    %181 = vector.shape_cast %166 : vector<16x8xf32> to vector<2x8x8xf32>
    %182 = vector.shape_cast %173 : vector<16x8xf32> to vector<2x8x8xf32>
    %183 = vector.shape_cast %180 : vector<16x8xf32> to vector<2x8x8xf32>
    "tpu.trace_start"() <{level = 10 : i32, message = "bqd,bkd->bqk"}> : () -> ()
    %cst_121 = arith.constant dense<0.000000e+00> : vector<2x8x8xf32>
    %184 = tpu.matmul %181, %182, %cst_121 {dimension_numbers = #tpu.dot_dimension_numbers<[2], [2], [1], [1], [0, 0, 0, 1, 1, 1], [0], [0]>} : vector<2x8x8xf32>, vector<2x8x8xf32>, vector<2x8x8xf32> -> vector<2x8x8xf32>
    %cst_122 = arith.constant -3.40282347E+38 : f32
    "tpu.trace_stop"() : () -> ()
    %185 = vector.broadcast %cst_122 : f32 to vector<2x8x8xf32>
    %186 = arith.select %20, %185, %184 : vector<2x8x8xi1>, vector<2x8x8xf32>
    %cst_123 = arith.constant dense<0xFF800000> : vector<2x8xf32>
    %187 = vector.multi_reduction <maximumf>, %186, %cst_123 [2] : vector<2x8x8xf32> to vector<2x8xf32>
    %188 = vector.shape_cast %187 : vector<2x8xf32> to vector<2x8x1xf32>
    %189 = vector.broadcast %188 : vector<2x8x1xf32> to vector<2x8x8xf32>
    %190 = arith.subf %186, %189 : vector<2x8x8xf32>
    %191 = math.exp %190 : vector<2x8x8xf32>
    %cst_124 = arith.constant dense<0.000000e+00> : vector<2x8xf32>
    %192 = vector.multi_reduction <add>, %191, %cst_124 [2] : vector<2x8x8xf32> to vector<2x8xf32>
    %193 = vector.shape_cast %192 : vector<2x8xf32> to vector<2x8x1xf32>
    %194 = tpu.reciprocal %193 {approx = true} : vector<2x8x1xf32> -> vector<2x8x1xf32>
    %195 = vector.broadcast %194 : vector<2x8x1xf32> to vector<2x8x8xf32>
    %196 = arith.mulf %191, %195 : vector<2x8x8xf32>
    "tpu.trace_start"() <{level = 10 : i32, message = "bqk,bkd->bqd"}> : () -> ()
    %cst_125 = arith.constant dense<0.000000e+00> : vector<2x8x8xf32>
    %197 = tpu.matmul %196, %183, %cst_125 {dimension_numbers = #tpu.dot_dimension_numbers<[2], [1], [1], [2], [0, 0, 0, 1, 1, 2], [0], [0]>} : vector<2x8x8xf32>, vector<2x8x8xf32>, vector<2x8x8xf32> -> vector<2x8x8xf32>
    "tpu.trace_stop"() : () -> ()
    %198 = vector.shape_cast %197 : vector<2x8x8xf32> to vector<16x8xf32>
    %c3_126 = arith.constant 3 : index
    %c0_127 = arith.constant 0 : index
    %c0_128 = arith.constant 0 : index
    %199 = vector.load %arg11[%c3_126, %c0_127, %c0_128] : memref<4x8x32xf32, #tpu.memory_space<vmem>>, vector<1x8x32xf32>
    %200 = vector.shape_cast %199 : vector<1x8x32xf32> to vector<8x32xf32>
    %cst_129 = arith.constant dense<0.000000e+00> : vector<16x32xf32>
    %201 = tpu.matmul %198, %200, %cst_129 {dimension_numbers = #tpu.dot_dimension_numbers<[1], [0], [0], [1], [0, 0, 1, 1], [], []>} : vector<16x8xf32>, vector<8x32xf32>, vector<16x32xf32> -> vector<16x32xf32>
    %202 = arith.addf %157, %201 : vector<16x32xf32>
    %c0_130 = arith.constant 0 : index
    %c0_131 = arith.constant 0 : index
    %203 = vector.load %arg13[%c0_130, %c0_131] : memref<16x32xf32, #tpu.memory_space<vmem>>, vector<16x32xf32>
    tpu.vector_store %arg13[%c0_130, %c0_131], %202 {strides = array<i32>} : memref<16x32xf32, #tpu.memory_space<vmem>>, vector<16x32xf32>,
    return
  }
  func.func @transform_0(%arg0: i32, %arg1: memref<2xi32, #tpu.memory_space<smem>>) -> (i32, i32) {
    %c0_i32 = arith.constant 0 : i32
    %c0_i32_0 = arith.constant 0 : i32
    %c0_i32_1 = arith.constant 0 : i32
    return %c0_i32, %c0_i32_0 : i32, i32
  }
  func.func @transform_1(%arg0: i32, %arg1: memref<2xi32, #tpu.memory_space<smem>>) -> (i32, i32) {
    %c0_i32 = arith.constant 0 : i32
    %c0_i32_0 = arith.constant 0 : i32
    %c0_i32_1 = arith.constant 0 : i32
    return %c0_i32, %c0_i32_0 : i32, i32
  }
  func.func @transform_2(%arg0: i32, %arg1: memref<2xi32, #tpu.memory_space<smem>>) -> (i32, i32) {
    %c0_i32 = arith.constant 0 : i32
    %c0_i32_0 = arith.constant 0 : i32
    %c0_i32_1 = arith.constant 0 : i32
    return %c0_i32, %c0_i32_0 : i32, i32
  }
  func.func @transform_3(%arg0: i32, %arg1: memref<2xi32, #tpu.memory_space<smem>>) -> (i32, i32, i32) {
    %c0_i32 = arith.constant 0 : i32
    %c0_i32_0 = arith.constant 0 : i32
    %c0_i32_1 = arith.constant 0 : i32
    %c0_i32_2 = arith.constant 0 : i32
    return %c0_i32, %c0_i32_0, %c0_i32_1 : i32, i32, i32
  }
  func.func @transform_4(%arg0: i32, %arg1: memref<2xi32, #tpu.memory_space<smem>>) -> (i32, i32, i32) {
    %c0_i32 = arith.constant 0 : i32
    %c0_i32_0 = arith.constant 0 : i32
    %c0_i32_1 = arith.constant 0 : i32
    %c0_i32_2 = arith.constant 0 : i32
    return %c0_i32, %c0_i32_0, %c0_i32_1 : i32, i32, i32
  }
  func.func @transform_5(%arg0: i32, %arg1: memref<2xi32, #tpu.memory_space<smem>>) -> (i32, i32, i32) {
    %c0_i32 = arith.constant 0 : i32
    %c0_i32_0 = arith.constant 0 : i32
    %c0_i32_1 = arith.constant 0 : i32
    %c0_i32_2 = arith.constant 0 : i32
    return %c0_i32, %c0_i32_0, %c0_i32_1 : i32, i32, i32
  }
  func.func @transform_6(%arg0: i32, %arg1: memref<2xi32, #tpu.memory_space<smem>>) -> (i32, i32, i32) {
    %c0_i32 = arith.constant 0 : i32
    %c0_i32_0 = arith.constant 0 : i32
    %c0_i32_1 = arith.constant 0 : i32
    %c0_i32_2 = arith.constant 0 : i32
    return %c0_i32, %c0_i32_0, %c0_i32_1 : i32, i32, i32
  }
  func.func @transform_7(%arg0: i32, %arg1: memref<2xi32, #tpu.memory_space<smem>>) -> (i32, i32, i32) {
    %c0_i32 = arith.constant 0 : i32
    %c0_i32_0 = arith.constant 0 : i32
    %c0_i32_1 = arith.constant 0 : i32
    %c0_i32_2 = arith.constant 0 : i32
    return %c0_i32, %c0_i32_0, %c0_i32_1 : i32, i32, i32
  }
  func.func @transform_8(%arg0: i32, %arg1: memref<2xi32, #tpu.memory_space<smem>>) -> (i32, i32, i32) {
    %c0_i32 = arith.constant 0 : i32
    %c0_i32_0 = arith.constant 0 : i32
    %c0_i32_1 = arith.constant 0 : i32
    %c0_i32_2 = arith.constant 0 : i32
    return %c0_i32, %c0_i32_0, %c0_i32_1 : i32, i32, i32
  }
  func.func @transform_9(%arg0: i32, %arg1: memref<2xi32, #tpu.memory_space<smem>>) -> (i32, i32, i32) {
    %c0_i32 = arith.constant 0 : i32
    %c0_i32_0 = arith.constant 0 : i32
    %c0_i32_1 = arith.constant 0 : i32
    %c0_i32_2 = arith.constant 0 : i32
    return %c0_i32, %c0_i32_0, %c0_i32_1 : i32, i32, i32
  }
  func.func @transform_10(%arg0: i32, %arg1: memref<2xi32, #tpu.memory_space<smem>>) -> (i32, i32) {
    %c0_i32 = arith.constant 0 : i32
    %c0_i32_0 = arith.constant 0 : i32
    %c0_i32_1 = arith.constant 0 : i32
    return %c0_i32, %c0_i32_0 : i32, i32
  }
  func.func @transform_11(%arg0: i32, %arg1: memref<2xi32, #tpu.memory_space<smem>>) -> (i32, i32) {
    %c0_i32 = arith.constant 0 : i32
    %c0_i32_0 = arith.constant 0 : i32
    %c0_i32_1 = arith.constant 0 : i32
    return %c0_i32, %c0_i32_0 : i32, i32
  }
}

</mosaic_0001>

<bundles_post_ra>
// kernel: tpu_custom_call.1
= control target key start
LH: loop header
LB: loop body
LE: loop exit
PB: predicated region body
PF: predicated region fallthrough
CT: control target
= control target key end

     0   :  { %s3825_s0 = inlined_call_operand.vmem [shape: s32[2], index: 0, kind: input, shape index: {}]   ;;  %s3826_s1 = inlined_call_operand.vmem [shape: f32[16,32], index: 1, kind: input, shape index: {}]   ;;  %s3827_s2 = inlined_call_operand.vmem [shape: f32[16,32], index: 2, kind: input, shape index: {}]   ;;  %s3828_s3 = inlined_call_operand.vmem [shape: f32[16,32], index: 3, kind: input, shape index: {}]   ;;  %s3829_s4 = inlined_call_operand.vmem [shape: f32[4,32,8], index: 4, kind: input, shape index: {}]   ;;  %s3830_s5 = inlined_call_operand.vmem [shape: f32[4,1,8], index: 5, kind: input, shape index: {}]   ;;  %s3831_s6 = inlined_call_operand.vmem [shape: f32[4,32,8], index: 6, kind: input, shape index: {}]   ;;  %s3832_s7 = inlined_call_operand.vmem [shape: f32[4,1,8], index: 7, kind: input, shape index: {}]   ;;  %s3833_s8 = inlined_call_operand.vmem [shape: f32[4,32,8], index: 8, kind: input, shape index: {}]   ;;  %s3834_s9 = inlined_call_operand.vmem [shape: f32[4,1,8], index: 9, kind: input, shape index: {}]   ;;  %s3835_s10 = inlined_call_operand.vmem [shape: f32[4,8,32], index: 10, kind: input, shape index: {}]   ;;  %s3836_s11 = inlined_call_operand.vmem [shape: f32[1,32], index: 11, kind: input, shape index: {}]   ;;  %s3837_s12 = inlined_call_operand.hbm [shape: f32[16,32], index: 12, kind: output, shape index: {}]  }
   0x1   :  { %s17_s23 = sshll.u32 %s3825_s0, 4  ;;  %s18_s23 = int_to_ptr.vmem [resolvable:$true] %s17_s23 }
   0x2   :  { %s3299_s24 = scalar_lea.vmem %s18_s23, 16  ;;  %p3304_p1 = scmp.lt.s32.totalorder %s18_s23, %s18_s23 }
   0x3   :  { %p3300_p0 = scmp.ne.s32.totalorder %s18_s23, %s3299_s24  ;;  %p3305_p2 = scmp.lt.s32.totalorder %s3299_s24, %s3299_s24 }
   0x5   :  { %p3306_p3 = por %p3305_p2, %p3304_p1 }
   0x7   :  { %p3307_p4 = pnand %p3306_p3, %p3300_p0 }
   0x9   :  { %3310 = shalt.err (!%p3307_p4)  }
   0xa   :  { %s3335_s25 = smov [#allocation3]  }
   0xb   :  { %20 = dma.vmem_to_smem %s18_s23, 16, %s3335_s25, [#allocation2] }
   0xc   :  { %3331 = dma.done.wait [#allocation2], 16 }
   0xd   :  { %3332 = vsyncadd [#allocation2], 4294967280 }
   0xe   :  { %22 = sfence }
   0xf   :  { %v75_v0 = vld [vmem:[%s3829_s4 + $0x18] sm:$0xff]  ;;  %v74_v2 = vld [vmem:[%s3829_s4 + $0x10] sm:$0xff]  ;;  %v73_v4 = vld [vmem:[%s3829_s4 + $0x8] sm:$0xff] }
  0x10   :  { %v170_v1 = vld [vmem:[%s3831_s6 + $0x18] sm:$0xff]  ;;  %3029 = vmatprep.subr.mxu0 %v75_v0  ;;  %v169_v3 = vld [vmem:[%s3831_s6 + $0x10] sm:$0xff]  ;;  %v168_v5 = vld [vmem:[%s3831_s6 + $0x8] sm:$0xff] }
  0x11   :  { %3040 = vmatprep.subr.mxu1 %v170_v1  ;;  %3030 = vmatpush3.msra.mxu0 %v75_v0  ;;  %v72_v6 = vld [vmem:[%s3829_s4] sm:$0xff] }
  0x12   :  { %3041 = vmatpush3.msra.mxu1 %v170_v1  ;;  %3031 = vmatprep.subr.mxu0 %v74_v2  ;;  %v167_v7 = vld [vmem:[%s3831_s6] sm:$0xff] }
  0x13   :  { %3042 = vmatprep.subr.mxu1 %v169_v3  ;;  %3032 = vmatpush3.msra.mxu0 %v74_v2 }
  0x14   :  { %3043 = vmatpush3.msra.mxu1 %v169_v3 }
  0x15   :  { %23 = vsyncpa [#allocation5], 0  ;;  %3033 = vmatprep.subr.mxu0 %v73_v4  ;;  %3044 = vmatprep.subr.mxu1 %v168_v5  ;;  %v3436_v8 = vld [vmem:[%s3826_s1] sm:$0xff]  ;;  %vm83_vm0 = vcmask 261120   ;;  %v3446_v10 = vld [vmem:[%s3826_s1 + $0x8] sm:$0xff]  ;;  %v3336_v12 = vmov 0.0   ;;  %v53_v31 = vlaneseq }
  0x16   :  { %3034 = vmatpush3.msra.mxu0 %v73_v4  ;;  %3045 = vmatpush3.msra.mxu1 %v168_v5  ;;  %v3441_v9 = vld [vmem:[%s3827_s2] sm:$0xff]  ;;  %v3451_v11 = vld [vmem:[%s3827_s2 + $0x8] sm:$0xff]  ;;  %vm3337_vm1 = vmmov 0   ;;  %vm351_vm2 = vcmask 64512   ;;  %v262_v25 = vld [vmem:[%s3833_s8 + $0x18] sm:$0xff]  ;;  %s58_s26 = sld [smem:[#allocation3]] }
  0x17   :  { %3035 = vmatprep.subr.mxu0 %v72_v6  ;;  %3046 = vmatprep.subr.mxu1 %v167_v7  ;;  %v2797_v14 = vld [vmem:[%s3830_s5] ss:$0 sm:$0xff]  ;;  %v261_v26 = vld [vmem:[%s3833_s8 + $0x10] sm:$0xff]  ;;  %v260_v28 = vld [vmem:[%s3833_s8 + $0x8] sm:$0xff]  ;;  %s2795_s27 = sld [smem:[#allocation3 + $0x1]]  ;;  %v54_v32 = vshrl.u32 %v53_v31, 7 }
  0x18   :  { %3036 = vmatpush3.msra.mxu0 %v72_v6  ;;  %3037 = vmatprep.mubr.msk.f32.mxu0 %vm83_vm0, %v3436_v8  ;;  %v2800_v16 = vld [vmem:[%s3832_s7] ss:$0 sm:$0xff]  ;;  %v3502_v30 = vld [vmem:[%s3828_s3 + $0x8] sm:$0xff]  ;;  %v56_v33 = vand.u32 127, %v53_v31  ;;  %v2817_v4 = vld [vmem:[%s3829_s4 + $0x38] sm:$0xff] }
  0x19   :  { %3047 = vmatpush3.msra.mxu1 %v167_v7  ;;  %3048 = vmatprep.mubr.msk.f32.mxu1 %vm83_vm0, %v3441_v9  ;;  %v3489_v27 = vld [vmem:[%s3828_s3] sm:$0xff]  ;;  %v2825_v5 = vld [vmem:[%s3831_s6 + $0x38] sm:$0xff]  ;;  %v2816_v6 = vld [vmem:[%s3829_s4 + $0x30] sm:$0xff] }
  0x1a   :  { %3038 = vmatmul.mubr.msk.f32.vlgmr.msra.gmra.mxu0 %vm83_vm0, %v3446_v10  ;;  %3049 = vmatmul.mubr.msk.f32.vlgmr.msra.gmra.mxu1 %vm83_vm0, %v3451_v11  ;;  %v259_v29 = vld [vmem:[%s3833_s8] sm:$0xff]  ;;  %vm57_vm3 = vcmp.gt.s32.totalorder %v56_v33, %v54_v32  ;;  %v2815_v7 = vld [vmem:[%s3829_s4 + $0x28] sm:$0xff] }
  0x1b   :  { %3062 = vmatprep.subr.mxu1 %v3336_v12  ;;  %3064 = vmatprep.mubr.msk.f32.mxu1 %vm3337_vm1, %v3336_v12  ;;  %v2803_v57 = vld [vmem:[%s3834_s9] ss:$0 sm:$0xff] }
  0x1c   :  { %3051 = vmatprep.subr.mxu0 %v262_v25  ;;  %3059 = vmatprep.mubr.msk.f32.mxu0 %vm83_vm0, %v3489_v27  ;;  %v59_v34 = vstv %s58_s26  ;;  %v674_v3 = vld [vmem:[%s3835_s10] sm:$0xff] }
  0x1d   :  { %3052 = vmatpush3.msra.mxu0 %v262_v25  ;;  %vm62_vm4 = vcmp.ge.s32.totalorder %v56_v33, %v59_v34  ;;  %v61_v35 = vstv %s2795_s27 }
  0x1e   :  { %3053 = vmatprep.subr.mxu0 %v261_v26  ;;  %vm3509_vm5 = vmor %vm57_vm3, %vm62_vm4  ;;  %vm63_vm6 = vcmp.ge.s32.totalorder %v56_v33, %v61_v35 }
  0x1f   :  { %3054 = vmatpush3.msra.mxu0 %v261_v26  ;;  %vm3516_vm7 = vmor %vm57_vm3, %vm63_vm6 }
  0x20   :  { %3055 = vmatprep.subr.mxu0 %v260_v28 }
  0x21   :  { %3056 = vmatpush3.msra.mxu0 %v260_v28  ;;  %v2827_v28 = vld [vmem:[%s3832_s7 + $0x1] ss:$0 sm:$0xff] }
  0x22   :  { %3057 = vmatprep.subr.mxu0 %v259_v29 }
  0x23   :  { %3058 = vmatpush3.msra.mxu0 %v259_v29 }
  0x24   :  { %3060 = vmatmul.mubr.msk.f32.vlgmr.msra.gmra.mxu0 %vm83_vm0, %v3502_v30  ;;  %3072 = vmatprep.subr.mxu0 %v3336_v12 }
  0x25   :  { %3074 = vmatprep.mubr.msk.f32.mxu0 %vm3337_vm1, %v3336_v12 }
  0xda   :  { %v3039_v13 = vpop.f32.mrf.mxu0  ;;  %v3050_v15 = vpop.f32.mrf.mxu1 }
  0xdb   :  { %v162_v22 = vadd.f32 %v3039_v13, %v2797_v14  ;;  %v256_v23 = vadd.f32 %v3050_v15, %v2800_v16  ;;  %v2814_v13 = vld [vmem:[%s3829_s4 + $0x20] sm:$0xff] }
  0xdc   :  { %v156_v17 = vpop.f32.mrf.mxu0  ;;  %v250_v18 = vpop.f32.mrf.mxu1 }
  0xdd   :  { %v157_v19 = vadd.f32 %v2797_v14, %v156_v17  ;;  %v251_v20 = vadd.f32 %v2800_v16, %v250_v18  ;;  %v166_v24 = vmul.f32 0.35355338, %v162_v22  ;;  %v2824_v17 = vld [vmem:[%s3831_s6 + $0x30] sm:$0xff] }
  0xdf   :  { %v165_v21 = vmul.f32 0.35355338, %v157_v19  ;;  %3063 = vmatpush3.xpose.msk.msra.mxu1 %vm351_vm2, %v251_v20  ;;  %v2823_v19 = vld [vmem:[%s3831_s6 + $0x28] sm:$0xff]  ;;  %v2822_v20 = vld [vmem:[%s3831_s6 + $0x20] sm:$0xff] }
  0xe0   :  { %3067 = vmatprep.subr.mxu1 %v3336_v12 }
  0xe2   :  { %3065 = vmatmul.mubr.msk.f32.vlgmr.msra.gmra.mxu1 %vm351_vm2, %v165_v21 }
  0xe3   :  { %3068 = vmatpush3.xpose.msk.msra.mxu1 %vm351_vm2, %v256_v23  ;;  %3069 = vmatprep.mubr.msk.f32.mxu1 %vm3337_vm1, %v3336_v12 }
  0xe4   :  { %3077 = vmatprep.subr.mxu1 %v3336_v12  ;;  %v3061_v56 = vpop.f32.mrf.mxu0 }
  0xe5   :  { %v348_v58 = vadd.f32 %v3061_v56, %v2803_v57 }
  0xe6   :  { %3070 = vmatmul.mubr.msk.f32.vlgmr.msra.gmra.mxu1 %vm351_vm2, %v166_v24  ;;  %v342_v59 = vpop.f32.mrf.mxu0  ;;  %v2819_v24 = vld [vmem:[%s3830_s5 + $0x1] ss:$0 sm:$0xff] }
  0xe7   :  { %3079 = vmatprep.mubr.msk.f32.mxu1 %vm3337_vm1, %v3336_v12  ;;  %v343_v60 = vadd.f32 %v2803_v57, %v342_v59  ;;  %3078 = vmatpush3.msra.mxu1 %v348_v58 }
  0xe8   :  { %3087 = vmatprep.subr.mxu1 %v2817_v4 }
  0xe9   :  { %3073 = vmatpush3.msra.mxu0 %v343_v60 }
  0xea   :  { %3082 = vmatprep.subr.mxu0 %v674_v3 }
 0x1a2   :  { %v424_v37 = vpop.f32.mrf.mxu1 }
 0x1a3   :  { %v504_v38 = vsel %vm3509_vm5, -3.4028235e+38, %v424_v37 }
 0x1a4   :  { %v3066_v39 = vpop.f32.mrf.mxu1  ;;  %v506_v40 = vsel %vm351_vm2, %v504_v38, -inf }
 0x1a5   :  { %507 = vmax.xlane.f32.xlu0 %v506_v40  ;;  %v2832_v39 = vld [vmem:[%s3833_s8 + $0x30] sm:$0xff]  ;;  %v2831_v40 = vld [vmem:[%s3833_s8 + $0x28] sm:$0xff] }
 0x1a6   :  { %v500_v42 = vpop.f32.mrf.mxu1 }
 0x1a7   :  { %v505_v43 = vsel %vm3516_vm7, -3.4028235e+38, %v500_v42  ;;  %v2830_v42 = vld [vmem:[%s3833_s8 + $0x20] sm:$0xff] }
 0x1a8   :  { %v3071_v44 = vpop.f32.mrf.mxu1  ;;  %v509_v45 = vsel %vm351_vm2, %v505_v43, -inf }
 0x1a9   :  { %510 = vmax.xlane.f32.xlu0 %v509_v45 }
 0x22e   :  { %v508_v46 = vpop.xlane.xlu0 %507 }
 0x22f   :  { %v512_v47 = vsub.f32 %v504_v38, %v508_v46  ;;  %v2833_v38 = vld [vmem:[%s3833_s8 + $0x38] sm:$0xff] }
 0x231   :  { %v514_v48 = vmul.f32 1.442695, %v512_v47 }
 0x232   :  { %v511_v49 = vpop.xlane.xlu0 %510 }
 0x233   :  { %3267 = vpow2.f32 %v514_v48  ;;  %v513_v50 = vsub.f32 %v505_v43, %v511_v49 }
 0x235   :  { %v516_v51 = vmul.f32 1.442695, %v513_v50 }
 0x237   :  { %3269 = vpow2.f32 %v516_v51 }
 0x240   :  { %v3268_v52 = vpop.eup %3267 }
 0x241   :  { %v518_v53 = vsel %vm351_vm2, %v3268_v52, 0.0 }
 0x242   :  { %519 = vadd.xlane.f32.xlu1 %v518_v53 }
 0x244   :  { %v3270_v54 = vpop.eup %3269 }
 0x245   :  { %v521_v55 = vsel %vm351_vm2, %v3270_v54, 0.0 }
 0x246   :  { %522 = vadd.xlane.f32.xlu1 %v521_v55 }
 0x2cb   :  { %v520_v61 = vpop.xlane.xlu1 %519 }
 0x2cc   :  { %3271 = vrcp.f32 %v520_v61 }
 0x2cf   :  { %v523_v62 = vpop.xlane.xlu1 %522 }
 0x2d0   :  { %3273 = vrcp.f32 %v523_v62  ;;  %v2835_v62 = vld [vmem:[%s3834_s9 + $0x1] ss:$0 sm:$0xff] }
 0x2d9   :  { %v3272_v63 = vpop.eup %3271 }
 0x2da   :  { %v526_v0 = vmul.f32 %v3272_v63, %v3268_v52 }
 0x2dc   :  { %3075 = vmatmul.mubr.msk.f32.vlgmr.msra.gmra.mxu0 %vm351_vm2, %v526_v0 }
 0x2dd   :  { %v3274_v1 = vpop.eup %3273  ;;  %3083 = vmatpush3.msra.mxu0 %v674_v3 }
 0x2de   :  { %v527_v2 = vmul.f32 %v3274_v1, %v3270_v54  ;;  %3098 = vmatprep.subr.mxu0 %v2825_v5 }
 0x2e0   :  { %3080 = vmatmul.mubr.msk.f32.vlgmr.msra.gmra.mxu1 %vm351_vm2, %v527_v2 }
 0x2e1   :  { %3095 = vmatprep.mubr.msk.f32.mxu1 %vm83_vm0, %v3436_v8  ;;  %3088 = vmatpush3.msra.mxu1 %v2817_v4 }
 0x2e2   :  { %3089 = vmatprep.subr.mxu1 %v2816_v6 }
 0x2e3   :  { %3090 = vmatpush3.msra.mxu1 %v2816_v6 }
 0x2e4   :  { %3091 = vmatprep.subr.mxu1 %v2815_v7 }
 0x2e5   :  { %3092 = vmatpush3.msra.mxu1 %v2815_v7 }
 0x2e6   :  { %3093 = vmatprep.subr.mxu1 %v2814_v13 }
 0x2e7   :  { %3094 = vmatpush3.msra.mxu1 %v2814_v13  ;;  %v2844_v13 = vld [vmem:[%s3835_s10 + $0x8] sm:$0xff] }
 0x2e8   :  { %3096 = vmatmul.mubr.msk.f32.vlgmr.msra.gmra.mxu1 %vm83_vm0, %v3446_v10  ;;  %3109 = vmatprep.subr.mxu1 %v2833_v38 }
 0x2e9   :  { %3117 = vmatprep.mubr.msk.f32.mxu1 %vm83_vm0, %v3489_v27  ;;  %3110 = vmatpush3.msra.mxu1 %v2833_v38 }
 0x2ea   :  { %3111 = vmatprep.subr.mxu1 %v2832_v39 }
 0x2eb   :  { %3112 = vmatpush3.msra.mxu1 %v2832_v39  ;;  %v2852_v39 = vld [vmem:[%s3830_s5 + $0x2] ss:$0 sm:$0xff] }
 0x2ec   :  { %3113 = vmatprep.subr.mxu1 %v2831_v40 }
 0x2ed   :  { %3114 = vmatpush3.msra.mxu1 %v2831_v40 }
 0x2ee   :  { %3115 = vmatprep.subr.mxu1 %v2830_v42 }
 0x2ef   :  { %3116 = vmatpush3.msra.mxu1 %v2830_v42 }
 0x2f0   :  { %3118 = vmatmul.mubr.msk.f32.vlgmr.msra.gmra.mxu1 %vm83_vm0, %v3502_v30  ;;  %3130 = vmatprep.subr.mxu1 %v3336_v12 }
 0x2f1   :  { %3132 = vmatprep.mubr.msk.f32.mxu1 %vm3337_vm1, %v3336_v12 }
 0x39c   :  { %v597_v14 = vpop.f32.mrf.mxu0 }
 0x39d   :  { %3084 = vmatprep.mubr.msk.f32.mxu0 %vm351_vm2, %v597_v14  ;;  %v2850_v14 = vld [vmem:[%s3829_s4 + $0x58] sm:$0xff] }
 0x39e   :  { %v3076_v15 = vpop.f32.mrf.mxu0 }
 0x39f   :  { %v2858_v15 = vld [vmem:[%s3831_s6 + $0x58] sm:$0xff] }
 0x3a0   :  { %v670_v16 = vpop.f32.mrf.mxu1 }
 0x3a1   :  { %3085 = vmatmul.mubr.msk.f32.vlgmr.msra.gmra.mxu0 %vm351_vm2, %v670_v16  ;;  %v2849_v16 = vld [vmem:[%s3829_s4 + $0x50] sm:$0xff] }
 0x3a2   :  { %3099 = vmatpush3.msra.mxu0 %v2825_v5  ;;  %v3081_v18 = vpop.f32.mrf.mxu1  ;;  %3106 = vmatprep.mubr.msk.f32.mxu0 %vm83_vm0, %v3441_v9 }
 0x3a3   :  { %3100 = vmatprep.subr.mxu0 %v2824_v17  ;;  %v2847_v18 = vld [vmem:[%s3829_s4 + $0x40] sm:$0xff] }
 0x3a4   :  { %3101 = vmatpush3.msra.mxu0 %v2824_v17  ;;  %v2848_v17 = vld [vmem:[%s3829_s4 + $0x48] sm:$0xff] }
 0x3a5   :  { %3102 = vmatprep.subr.mxu0 %v2823_v19 }
 0x3a6   :  { %3103 = vmatpush3.msra.mxu0 %v2823_v19 }
 0x3a7   :  { %3104 = vmatprep.subr.mxu0 %v2822_v20 }
 0x3a8   :  { %3105 = vmatpush3.msra.mxu0 %v2822_v20  ;;  %v3097_v22 = vpop.f32.mrf.mxu1 }
 0x3a9   :  { %3107 = vmatmul.mubr.msk.f32.vlgmr.msra.gmra.mxu0 %vm83_vm0, %v3451_v11  ;;  %3120 = vmatprep.subr.mxu0 %v3336_v12  ;;  %v843_v33 = vadd.f32 %v3097_v22, %v2819_v24 }
 0x3aa   :  { %3122 = vmatprep.mubr.msk.f32.mxu0 %vm3337_vm1, %v3336_v12  ;;  %v837_v25 = vpop.f32.mrf.mxu1 }
 0x3ab   :  { %v838_v29 = vadd.f32 %v2819_v24, %v837_v25  ;;  %v847_v37 = vmul.f32 0.35355338, %v843_v33  ;;  %v2857_v24 = vld [vmem:[%s3831_s6 + $0x50] sm:$0xff] }
 0x3ad   :  { %v846_v34 = vmul.f32 0.35355338, %v838_v29  ;;  %v2796_v29 = vld [vmem:[%s3836_s11] ss:$0 sm:$0xff] }
 0x3b0   :  { %v3119_v61 = vpop.f32.mrf.mxu1 }
 0x3b1   :  { %v1021_v63 = vadd.f32 %v3119_v61, %v2835_v62 }
 0x3b2   :  { %v1015_v0 = vpop.f32.mrf.mxu1 }
 0x3b3   :  { %v1016_v1 = vadd.f32 %v2835_v62, %v1015_v0 }
 0x3b5   :  { %3131 = vmatpush3.msra.mxu1 %v1016_v1 }
 0x3b6   :  { %3140 = vmatprep.subr.mxu1 %v2844_v13 }
 0x461   :  { %v3572_v21 = vpop.f32.mrf.mxu0 }
 0x463   :  { %v3574_v23 = vpop.f32.mrf.mxu0 }
 0x464   :  { %v756_v33 = vadd.f32 %v2796_v29, %v3574_v23 }
 0x469   :  { %v3108_v26 = vpop.f32.mrf.mxu0 }
 0x46a   :  { %v933_v35 = vadd.f32 %v3108_v26, %v2827_v28  ;;  %v2856_v26 = vld [vmem:[%s3831_s6 + $0x48] sm:$0xff] }
 0x46b   :  { %v927_v31 = vpop.f32.mrf.mxu0 }
 0x46c   :  { %v928_v32 = vadd.f32 %v2827_v28, %v927_v31  ;;  %v2855_v28 = vld [vmem:[%s3831_s6 + $0x40] sm:$0xff]  ;;  %v757_v31 = vadd.f32 %v3572_v21, %v2796_v29  ;;  %v2881_v29 = vld [vmem:[%s3829_s4 + $0x68] sm:$0xff] }
 0x46e   :  { %3121 = vmatpush3.xpose.msk.msra.mxu0 %vm351_vm2, %v928_v32 }
 0x46f   :  { %3125 = vmatprep.subr.mxu0 %v3336_v12 }
 0x471   :  { %3123 = vmatmul.mubr.msk.f32.vlgmr.msra.gmra.mxu0 %vm351_vm2, %v846_v34 }
 0x472   :  { %3126 = vmatpush3.xpose.msk.msra.mxu0 %vm351_vm2, %v933_v35  ;;  %3127 = vmatprep.mubr.msk.f32.mxu0 %vm3337_vm1, %v3336_v12 }
 0x473   :  { %3135 = vmatprep.subr.mxu0 %v3336_v12 }
 0x475   :  { %3128 = vmatmul.mubr.msk.f32.vlgmr.msra.gmra.mxu0 %vm351_vm2, %v847_v37 }
 0x476   :  { %3137 = vmatprep.mubr.msk.f32.mxu0 %vm3337_vm1, %v3336_v12  ;;  %3136 = vmatpush3.msra.mxu0 %v1021_v63 }
 0x477   :  { %3145 = vmatprep.subr.mxu0 %v2850_v14 }
 0x531   :  { %v1096_v43 = vpop.f32.mrf.mxu0 }
 0x532   :  { %v1176_v44 = vsel %vm3509_vm5, -3.4028235e+38, %v1096_v43  ;;  %v2860_v43 = vld [vmem:[%s3832_s7 + $0x2] ss:$0 sm:$0xff] }
 0x533   :  { %v3124_v45 = vpop.f32.mrf.mxu0  ;;  %v1178_v46 = vsel %vm351_vm2, %v1176_v44, -inf }
 0x534   :  { %1179 = vmax.xlane.f32.xlu0 %v1178_v46 }
 0x535   :  { %v1172_v47 = vpop.f32.mrf.mxu0 }
 0x536   :  { %v1177_v48 = vsel %vm3516_vm7, -3.4028235e+38, %v1172_v47 }
 0x537   :  { %v3129_v49 = vpop.f32.mrf.mxu0  ;;  %v1181_v50 = vsel %vm351_vm2, %v1177_v48, -inf }
 0x538   :  { %1182 = vmax.xlane.f32.xlu1 %v1181_v50  ;;  %v2866_v49 = vld [vmem:[%s3833_s8 + $0x58] sm:$0xff]  ;;  %v2865_v50 = vld [vmem:[%s3833_s8 + $0x50] sm:$0xff] }
 0x5bd   :  { %v1180_v51 = vpop.xlane.xlu0 %1179 }
 0x5be   :  { %v1184_v52 = vsub.f32 %v1176_v44, %v1180_v51  ;;  %v2864_v51 = vld [vmem:[%s3833_s8 + $0x48] sm:$0xff] }
 0x5c0   :  { %v1186_v53 = vmul.f32 1.442695, %v1184_v52  ;;  %v2863_v52 = vld [vmem:[%s3833_s8 + $0x40] sm:$0xff] }
 0x5c1   :  { %v1183_v54 = vpop.xlane.xlu1 %1182 }
 0x5c2   :  { %3275 = vpow2.f32 %v1186_v53  ;;  %v1185_v55 = vsub.f32 %v1177_v48, %v1183_v54 }
 0x5c4   :  { %v1188_v56 = vmul.f32 1.442695, %v1185_v55 }
 0x5c6   :  { %3277 = vpow2.f32 %v1188_v56 }
 0x5cf   :  { %v3276_v57 = vpop.eup %3275 }
 0x5d0   :  { %v1190_v58 = vsel %vm351_vm2, %v3276_v57, 0.0 }
 0x5d1   :  { %1191 = vadd.xlane.f32.xlu0 %v1190_v58 }
 0x5d3   :  { %v3278_v59 = vpop.eup %3277 }
 0x5d4   :  { %v1193_v60 = vsel %vm351_vm2, %v3278_v59, 0.0 }
 0x5d5   :  { %1194 = vadd.xlane.f32.xlu1 %v1193_v60 }
 0x65a   :  { %v1192_v2 = vpop.xlane.xlu0 %1191 }
 0x65b   :  { %3279 = vrcp.f32 %v1192_v2 }
 0x65e   :  { %v1195_v3 = vpop.xlane.xlu1 %1194 }
 0x65f   :  { %3281 = vrcp.f32 %v1195_v3 }
 0x668   :  { %v3280_v4 = vpop.eup %3279 }
 0x669   :  { %v1198_v5 = vmul.f32 %v3280_v4, %v3276_v57 }
 0x66b   :  { %3133 = vmatmul.mubr.msk.f32.vlgmr.msra.gmra.mxu1 %vm351_vm2, %v1198_v5 }
 0x66c   :  { %v3282_v6 = vpop.eup %3281  ;;  %3141 = vmatpush3.msra.mxu1 %v2844_v13  ;;  %v2868_v13 = vld [vmem:[%s3834_s9 + $0x2] ss:$0 sm:$0xff] }
 0x66d   :  { %v1199_v7 = vmul.f32 %v3282_v6, %v3278_v59  ;;  %3156 = vmatprep.subr.mxu1 %v2858_v15 }
 0x66f   :  { %3138 = vmatmul.mubr.msk.f32.vlgmr.msra.gmra.mxu0 %vm351_vm2, %v1199_v7 }
 0x670   :  { %3153 = vmatprep.mubr.msk.f32.mxu0 %vm83_vm0, %v3436_v8  ;;  %3146 = vmatpush3.msra.mxu0 %v2850_v14 }
 0x671   :  { %3147 = vmatprep.subr.mxu0 %v2849_v16 }
 0x672   :  { %3148 = vmatpush3.msra.mxu0 %v2849_v16 }
 0x673   :  { %3149 = vmatprep.subr.mxu0 %v2848_v17 }
 0x674   :  { %3150 = vmatpush3.msra.mxu0 %v2848_v17 }
 0x675   :  { %3151 = vmatprep.subr.mxu0 %v2847_v18 }
 0x676   :  { %3152 = vmatpush3.msra.mxu0 %v2847_v18 }
 0x677   :  { %3154 = vmatmul.mubr.msk.f32.vlgmr.msra.gmra.mxu0 %vm83_vm0, %v3446_v10  ;;  %3167 = vmatprep.subr.mxu0 %v2866_v49 }
 0x678   :  { %3175 = vmatprep.mubr.msk.f32.mxu0 %vm83_vm0, %v3489_v27  ;;  %3168 = vmatpush3.msra.mxu0 %v2866_v49 }
 0x679   :  { %3169 = vmatprep.subr.mxu0 %v2865_v50 }
 0x67a   :  { %3170 = vmatpush3.msra.mxu0 %v2865_v50 }
 0x67b   :  { %3171 = vmatprep.subr.mxu0 %v2864_v51 }
 0x67c   :  { %3172 = vmatpush3.msra.mxu0 %v2864_v51  ;;  %v2899_v51 = vld [vmem:[%s3833_s8 + $0x78] sm:$0xff] }
 0x67d   :  { %3173 = vmatprep.subr.mxu0 %v2863_v52 }
 0x67e   :  { %3174 = vmatpush3.msra.mxu0 %v2863_v52  ;;  %v2898_v52 = vld [vmem:[%s3833_s8 + $0x70] sm:$0xff] }
 0x67f   :  { %3176 = vmatmul.mubr.msk.f32.vlgmr.msra.gmra.mxu0 %vm83_vm0, %v3502_v30  ;;  %3188 = vmatprep.subr.mxu0 %v3336_v12 }
 0x680   :  { %3190 = vmatprep.mubr.msk.f32.mxu0 %vm3337_vm1, %v3336_v12 }
 0x72b   :  { %v1269_v19 = vpop.f32.mrf.mxu1 }
 0x72c   :  { %3142 = vmatprep.mubr.msk.f32.mxu1 %vm351_vm2, %v1269_v19 }
 0x72d   :  { %v3134_v20 = vpop.f32.mrf.mxu1 }
 0x72f   :  { %v1342_v22 = vpop.f32.mrf.mxu0 }
 0x730   :  { %3143 = vmatmul.mubr.msk.f32.vlgmr.msra.gmra.mxu1 %vm351_vm2, %v1342_v22 }
 0x731   :  { %3157 = vmatpush3.msra.mxu1 %v2858_v15  ;;  %v3139_v25 = vpop.f32.mrf.mxu0  ;;  %3164 = vmatprep.mubr.msk.f32.mxu1 %vm83_vm0, %v3441_v9 }
 0x732   :  { %3158 = vmatprep.subr.mxu1 %v2857_v24  ;;  %v2877_v25 = vld [vmem:[%s3835_s10 + $0x10] sm:$0xff] }
 0x733   :  { %3159 = vmatpush3.msra.mxu1 %v2857_v24 }
 0x734   :  { %3160 = vmatprep.subr.mxu1 %v2856_v26 }
 0x735   :  { %3161 = vmatpush3.msra.mxu1 %v2856_v26  ;;  %v2883_v26 = vld [vmem:[%s3829_s4 + $0x78] sm:$0xff] }
 0x736   :  { %3162 = vmatprep.subr.mxu1 %v2855_v28 }
 0x737   :  { %3163 = vmatpush3.msra.mxu1 %v2855_v28  ;;  %v3155_v38 = vpop.f32.mrf.mxu0  ;;  %v2891_v28 = vld [vmem:[%s3831_s6 + $0x78] sm:$0xff] }
 0x738   :  { %3165 = vmatmul.mubr.msk.f32.vlgmr.msra.gmra.mxu1 %vm83_vm0, %v3451_v11  ;;  %3178 = vmatprep.subr.mxu1 %v3336_v12  ;;  %v1516_v23 = vadd.f32 %v3155_v38, %v2852_v39  ;;  %v2890_v38 = vld [vmem:[%s3831_s6 + $0x70] sm:$0xff] }
 0x739   :  { %3180 = vmatprep.mubr.msk.f32.mxu1 %vm3337_vm1, %v3336_v12  ;;  %v1510_v40 = vpop.f32.mrf.mxu0 }
 0x73a   :  { %v1511_v21 = vadd.f32 %v2852_v39, %v1510_v40  ;;  %v1520_v48 = vmul.f32 0.35355338, %v1516_v23  ;;  %v2893_v23 = vld [vmem:[%s3832_s7 + $0x3] ss:$0 sm:$0xff] }
 0x73c   :  { %v1519_v46 = vmul.f32 0.35355338, %v1511_v21 }
 0x73f   :  { %v3177_v7 = vpop.f32.mrf.mxu0 }
 0x740   :  { %v1694_v14 = vadd.f32 %v3177_v7, %v2868_v13 }
 0x741   :  { %v1688_v15 = vpop.f32.mrf.mxu0 }
 0x742   :  { %v1689_v16 = vadd.f32 %v2868_v13, %v1688_v15 }
 0x744   :  { %3189 = vmatpush3.msra.mxu0 %v1689_v16 }
 0x745   :  { %3198 = vmatprep.subr.mxu0 %v2877_v25 }
 0x7f0   :  { %v3144_v32 = vpop.f32.mrf.mxu1 }
 0x7f1   :  { %v3669_v34 = vadd.f32 %v3144_v32, %v757_v31  ;;  %v2880_v31 = vld [vmem:[%s3829_s4 + $0x60] sm:$0xff] }
 0x7f2   :  { %v1420_v35 = vpop.f32.mrf.mxu1 }
 0x7f3   :  { %v3671_v37 = vadd.f32 %v1420_v35, %v756_v33 }
 0x7f8   :  { %v3166_v42 = vpop.f32.mrf.mxu1 }
 0x7f9   :  { %v1606_v47 = vadd.f32 %v3166_v42, %v2860_v43 }
 0x7fa   :  { %v1600_v44 = vpop.f32.mrf.mxu1 }
 0x7fb   :  { %v1601_v45 = vadd.f32 %v2860_v43, %v1600_v44  ;;  %v2885_v44 = vld [vmem:[%s3830_s5 + $0x3] ss:$0 sm:$0xff] }
 0x7fd   :  { %3179 = vmatpush3.xpose.msk.msra.mxu1 %vm351_vm2, %v1601_v45 }
 0x7fe   :  { %3183 = vmatprep.subr.mxu1 %v3336_v12 }
 0x800   :  { %3181 = vmatmul.mubr.msk.f32.vlgmr.msra.gmra.mxu1 %vm351_vm2, %v1519_v46 }
 0x801   :  { %3184 = vmatpush3.xpose.msk.msra.mxu1 %vm351_vm2, %v1606_v47  ;;  %3185 = vmatprep.mubr.msk.f32.mxu1 %vm3337_vm1, %v3336_v12 }
 0x802   :  { %3193 = vmatprep.subr.mxu1 %v3336_v12 }
 0x804   :  { %3186 = vmatmul.mubr.msk.f32.vlgmr.msra.gmra.mxu1 %vm351_vm2, %v1520_v48 }
 0x805   :  { %3195 = vmatprep.mubr.msk.f32.mxu1 %vm3337_vm1, %v3336_v12  ;;  %3194 = vmatpush3.msra.mxu1 %v1694_v14 }
 0x806   :  { %3203 = vmatprep.subr.mxu1 %v2883_v26 }
 0x8c0   :  { %v1769_v53 = vpop.f32.mrf.mxu1 }
 0x8c1   :  { %v1849_v54 = vsel %vm3509_vm5, -3.4028235e+38, %v1769_v53  ;;  %v2897_v53 = vld [vmem:[%s3833_s8 + $0x68] sm:$0xff] }
 0x8c2   :  { %v3182_v55 = vpop.f32.mrf.mxu1  ;;  %v1851_v56 = vsel %vm351_vm2, %v1849_v54, -inf }
 0x8c3   :  { %1852 = vmax.xlane.f32.xlu0 %v1851_v56 }
 0x8c4   :  { %v1845_v57 = vpop.f32.mrf.mxu1 }
 0x8c5   :  { %v1850_v58 = vsel %vm3516_vm7, -3.4028235e+38, %v1845_v57 }
 0x8c6   :  { %v3187_v59 = vpop.f32.mrf.mxu1  ;;  %v1854_v60 = vsel %vm351_vm2, %v1850_v58, -inf }
 0x8c7   :  { %1855 = vmax.xlane.f32.xlu1 %v1854_v60 }
 0x94c   :  { %v1853_v61 = vpop.xlane.xlu0 %1852 }
 0x94d   :  { %v1857_v62 = vsub.f32 %v1849_v54, %v1853_v61  ;;  %v2896_v54 = vld [vmem:[%s3833_s8 + $0x60] sm:$0xff] }
 0x94f   :  { %v1859_v63 = vmul.f32 1.442695, %v1857_v62 }
 0x950   :  { %v1856_v0 = vpop.xlane.xlu1 %1855 }
 0x951   :  { %3283 = vpow2.f32 %v1859_v63  ;;  %v1858_v1 = vsub.f32 %v1850_v58, %v1856_v0 }
 0x953   :  { %v1861_v2 = vmul.f32 1.442695, %v1858_v1 }
 0x955   :  { %3285 = vpow2.f32 %v1861_v2 }
 0x95e   :  { %v3284_v3 = vpop.eup %3283 }
 0x95f   :  { %v1863_v4 = vsel %vm351_vm2, %v3284_v3, 0.0 }
 0x960   :  { %1864 = vadd.xlane.f32.xlu0 %v1863_v4 }
 0x962   :  { %v3286_v5 = vpop.eup %3285 }
 0x963   :  { %v1866_v6 = vsel %vm351_vm2, %v3286_v5, 0.0 }
 0x964   :  { %1867 = vadd.xlane.f32.xlu1 %v1866_v6  ;;  %v2901_v6 = vld [vmem:[%s3834_s9 + $0x3] ss:$0 sm:$0xff]  ;;  %s3338_s9 = smov [#allocation4]  }
 0x965   :  { %s2784_s13 = sshll.u32 %s3338_s9, 4  ;;  %s2785_s13 = int_to_ptr.vmem [resolvable:$true] %s2784_s13 }
 0x966   :  { %p3316_p6 = scmp.lt.s32.totalorder %s2785_s13, %s2785_s13 }
 0x9e9   :  { %v1865_v17 = vpop.xlane.xlu0 %1864 }
 0x9ea   :  { %3287 = vrcp.f32 %v1865_v17 }
 0x9ed   :  { %v1868_v18 = vpop.xlane.xlu1 %1867 }
 0x9ee   :  { %3289 = vrcp.f32 %v1868_v18 }
 0x9f7   :  { %v3288_v19 = vpop.eup %3287 }
 0x9f8   :  { %v1871_v20 = vmul.f32 %v3288_v19, %v3284_v3 }
 0x9fa   :  { %3191 = vmatmul.mubr.msk.f32.vlgmr.msra.gmra.mxu0 %vm351_vm2, %v1871_v20 }
 0x9fb   :  { %v3290_v22 = vpop.eup %3289  ;;  %3199 = vmatpush3.msra.mxu0 %v2877_v25 }
 0x9fc   :  { %v1872_v24 = vmul.f32 %v3290_v22, %v3286_v5  ;;  %3214 = vmatprep.subr.mxu0 %v2891_v28  ;;  %v2910_v22 = vld [vmem:[%s3835_s10 + $0x18] sm:$0xff]  ;;  %s3311_s10 = scalar_lea.vmem %s2785_s13, 256 }
 0x9fd   :  { %p3312_p5 = scmp.ne.s32.totalorder %s2785_s13, %s3311_s10  ;;  %p3317_p7 = scmp.lt.s32.totalorder %s3311_s10, %s3311_s10 }
 0x9fe   :  { %3196 = vmatmul.mubr.msk.f32.vlgmr.msra.gmra.mxu1 %vm351_vm2, %v1872_v24 }
 0x9ff   :  { %3211 = vmatprep.mubr.msk.f32.mxu1 %vm83_vm0, %v3436_v8  ;;  %3204 = vmatpush3.msra.mxu1 %v2883_v26  ;;  %v2882_v8 = vld [vmem:[%s3829_s4 + $0x70] sm:$0xff]  ;;  %p3318_p8 = por %p3317_p7, %p3316_p6 }
 0xa00   :  { %3205 = vmatprep.subr.mxu1 %v2882_v8 }
 0xa01   :  { %3206 = vmatpush3.msra.mxu1 %v2882_v8  ;;  %p3319_p9 = pnand %p3318_p8, %p3312_p5 }
 0xa02   :  { %3207 = vmatprep.subr.mxu1 %v2881_v29 }
 0xa03   :  { %3208 = vmatpush3.msra.mxu1 %v2881_v29 }
 0xa04   :  { %3209 = vmatprep.subr.mxu1 %v2880_v31 }
 0xa05   :  { %3210 = vmatpush3.msra.mxu1 %v2880_v31 }
 0xa06   :  { %3212 = vmatmul.mubr.msk.f32.vlgmr.msra.gmra.mxu1 %vm83_vm0, %v3446_v10  ;;  %v2889_v10 = vld [vmem:[%s3831_s6 + $0x68] sm:$0xff]  ;;  %3225 = vmatprep.subr.mxu1 %v2899_v51 }
 0xa07   :  { %3233 = vmatprep.mubr.msk.f32.mxu1 %vm83_vm0, %v3489_v27  ;;  %v2888_v27 = vld [vmem:[%s3831_s6 + $0x60] sm:$0xff]  ;;  %3226 = vmatpush3.msra.mxu1 %v2899_v51 }
 0xa08   :  { %3227 = vmatprep.subr.mxu1 %v2898_v52 }
 0xa09   :  { %3228 = vmatpush3.msra.mxu1 %v2898_v52 }
 0xa0a   :  { %3229 = vmatprep.subr.mxu1 %v2897_v53 }
 0xa0b   :  { %3230 = vmatpush3.msra.mxu1 %v2897_v53 }
 0xa0c   :  { %3231 = vmatprep.subr.mxu1 %v2896_v54 }
 0xa0d   :  { %3232 = vmatpush3.msra.mxu1 %v2896_v54 }
 0xa0e   :  { %3234 = vmatmul.mubr.msk.f32.vlgmr.msra.gmra.mxu1 %vm83_vm0, %v3502_v30  ;;  %3246 = vmatprep.subr.mxu1 %v3336_v12 }
 0xa0f   :  { %3248 = vmatprep.mubr.msk.f32.mxu1 %vm3337_vm1, %v3336_v12 }
 0xaba   :  { %v1942_v32 = vpop.f32.mrf.mxu0 }
 0xabb   :  { %3200 = vmatprep.mubr.msk.f32.mxu0 %vm351_vm2, %v1942_v32 }
 0xabc   :  { %v3192_v33 = vpop.f32.mrf.mxu0 }
 0xabe   :  { %v2015_v35 = vpop.f32.mrf.mxu1 }
 0xabf   :  { %3201 = vmatmul.mubr.msk.f32.vlgmr.msra.gmra.mxu0 %vm351_vm2, %v2015_v35 }
 0xac0   :  { %3215 = vmatpush3.msra.mxu0 %v2891_v28  ;;  %v3197_v39 = vpop.f32.mrf.mxu1  ;;  %3222 = vmatprep.mubr.msk.f32.mxu0 %vm83_vm0, %v3441_v9 }
 0xac1   :  { %3216 = vmatprep.subr.mxu0 %v2890_v38 }
 0xac2   :  { %3217 = vmatpush3.msra.mxu0 %v2890_v38 }
 0xac3   :  { %3218 = vmatprep.subr.mxu0 %v2889_v10 }
 0xac4   :  { %3219 = vmatpush3.msra.mxu0 %v2889_v10 }
 0xac5   :  { %3220 = vmatprep.subr.mxu0 %v2888_v27 }
 0xac6   :  { %3221 = vmatpush3.msra.mxu0 %v2888_v27  ;;  %v3213_v21 = vpop.f32.mrf.mxu1 }
 0xac7   :  { %3223 = vmatmul.mubr.msk.f32.vlgmr.msra.gmra.mxu0 %vm83_vm0, %v3451_v11  ;;  %3236 = vmatprep.subr.mxu0 %v3336_v12 }
 0xac8   :  { %3238 = vmatprep.mubr.msk.f32.mxu0 %vm3337_vm1, %v3336_v12  ;;  %v2183_v45 = vpop.f32.mrf.mxu1 }
 0xac9   :  { %v2184_v46 = vadd.f32 %v2885_v44, %v2183_v45 }
 0xacb   :  { %v2192_v49 = vmul.f32 0.35355338, %v2184_v46 }
 0xace   :  { %v3235_v5 = vpop.f32.mrf.mxu1 }
 0xacf   :  { %v2367_v7 = vadd.f32 %v3235_v5, %v2901_v6 }
 0xad0   :  { %v2361_v13 = vpop.f32.mrf.mxu1 }
 0xad1   :  { %v2362_v14 = vadd.f32 %v2901_v6, %v2361_v13 }
 0xad3   :  { %3247 = vmatpush3.msra.mxu1 %v2362_v14 }
 0xad4   :  { %3256 = vmatprep.subr.mxu1 %v2910_v22 }
 0xb7f   :  { %v3202_v40 = vpop.f32.mrf.mxu0 }
 0xb80   :  { %v3762_v9 = vadd.f32 %v3202_v40, %v3669_v34  ;;  %v2189_v34 = vadd.f32 %v3213_v21, %v2885_v44 }
 0xb81   :  { %v2093_v42 = vpop.f32.mrf.mxu0 }
 0xb82   :  { %v3765_v43 = vadd.f32 %v2093_v42, %v3671_v37  ;;  %v2193_v50 = vmul.f32 0.35355338, %v2189_v34 }
 0xb87   :  { %v3224_v11 = vpop.f32.mrf.mxu0 }
 0xb88   :  { %v2279_v37 = vadd.f32 %v3224_v11, %v2893_v23 }
 0xb89   :  { %v2273_v47 = vpop.f32.mrf.mxu0 }
 0xb8a   :  { %v2274_v48 = vadd.f32 %v2893_v23, %v2273_v47 }
 0xb8c   :  { %3237 = vmatpush3.xpose.msk.msra.mxu0 %vm351_vm2, %v2274_v48 }
 0xb8d   :  { %3241 = vmatprep.subr.mxu0 %v3336_v12 }
 0xb8f   :  { %3239 = vmatmul.mubr.msk.f32.vlgmr.msra.gmra.mxu0 %vm351_vm2, %v2192_v49 }
 0xb90   :  { %3242 = vmatpush3.xpose.msk.msra.mxu0 %vm351_vm2, %v2279_v37  ;;  %3243 = vmatprep.mubr.msk.f32.mxu0 %vm3337_vm1, %v3336_v12 }
 0xb91   :  { %3251 = vmatprep.subr.mxu0 %v3336_v12 }
 0xb93   :  { %3244 = vmatmul.mubr.msk.f32.vlgmr.msra.gmra.mxu0 %vm351_vm2, %v2193_v50 }
 0xb94   :  { %3253 = vmatprep.mubr.msk.f32.mxu0 %vm3337_vm1, %v3336_v12  ;;  %3252 = vmatpush3.msra.mxu0 %v2367_v7 }
 0xc4f   :  { %v2442_v55 = vpop.f32.mrf.mxu0 }
 0xc50   :  { %v2522_v56 = vsel %vm3509_vm5, -3.4028235e+38, %v2442_v55 }
 0xc51   :  { %v3240_v57 = vpop.f32.mrf.mxu0  ;;  %v2524_v58 = vsel %vm351_vm2, %v2522_v56, -inf }
 0xc52   :  { %2525 = vmax.xlane.f32.xlu0 %v2524_v58 }
 0xc53   :  { %v2518_v59 = vpop.f32.mrf.mxu0 }
 0xc54   :  { %v2523_v60 = vsel %vm3516_vm7, -3.4028235e+38, %v2518_v59 }
 0xc55   :  { %v3245_v61 = vpop.f32.mrf.mxu0  ;;  %v2527_v30 = vsel %vm351_vm2, %v2523_v60, -inf }
 0xc56   :  { %2528 = vmax.xlane.f32.xlu1 %v2527_v30 }
 0xcdb   :  { %v2526_v62 = vpop.xlane.xlu0 %2525 }
 0xcdc   :  { %v2530_v63 = vsub.f32 %v2522_v56, %v2526_v62 }
 0xcde   :  { %v2532_v0 = vmul.f32 1.442695, %v2530_v63 }
 0xcdf   :  { %v2529_v12 = vpop.xlane.xlu1 %2528 }
 0xce0   :  { %3291 = vpow2.f32 %v2532_v0  ;;  %v2531_v1 = vsub.f32 %v2523_v60, %v2529_v12 }
 0xce2   :  { %v2534_v36 = vmul.f32 1.442695, %v2531_v1 }
 0xce4   :  { %3293 = vpow2.f32 %v2534_v36 }
 0xced   :  { %v3292_v2 = vpop.eup %3291 }
 0xcee   :  { %v2536_v3 = vsel %vm351_vm2, %v3292_v2, 0.0 }
 0xcef   :  { %2537 = vadd.xlane.f32.xlu0 %v2536_v3 }
 0xcf1   :  { %v3294_v4 = vpop.eup %3293 }
 0xcf2   :  { %v2539_v41 = vsel %vm351_vm2, %v3294_v4, 0.0 }
 0xcf3   :  { %2540 = vadd.xlane.f32.xlu1 %v2539_v41 }
 0xd78   :  { %v2538_v15 = vpop.xlane.xlu0 %2537 }
 0xd79   :  { %3295 = vrcp.f32 %v2538_v15 }
 0xd7c   :  { %v2541_v16 = vpop.xlane.xlu1 %2540 }
 0xd7d   :  { %3297 = vrcp.f32 %v2541_v16 }
 0xd86   :  { %v3296_v17 = vpop.eup %3295 }
 0xd87   :  { %v2544_v18 = vmul.f32 %v3296_v17, %v3292_v2 }
 0xd89   :  { %3249 = vmatmul.mubr.msk.f32.vlgmr.msra.gmra.mxu1 %vm351_vm2, %v2544_v18 }
 0xd8a   :  { %v3298_v19 = vpop.eup %3297  ;;  %3257 = vmatpush3.msra.mxu1 %v2910_v22 }
 0xd8b   :  { %v2545_v20 = vmul.f32 %v3298_v19, %v3294_v4 }
 0xd8d   :  { %3254 = vmatmul.mubr.msk.f32.vlgmr.msra.gmra.mxu0 %vm351_vm2, %v2545_v20 }
 0xe49   :  { %v2615_v24 = vpop.f32.mrf.mxu1 }
 0xe4a   :  { %3258 = vmatprep.mubr.msk.f32.mxu1 %vm351_vm2, %v2615_v24 }
 0xe4b   :  { %v3250_v25 = vpop.f32.mrf.mxu1 }
 0xe4d   :  { %v2688_v26 = vpop.f32.mrf.mxu0 }
 0xe4e   :  { %3259 = vmatmul.mubr.msk.f32.vlgmr.msra.gmra.mxu1 %vm351_vm2, %v2688_v26 }
 0xe4f   :  { %v3255_v28 = vpop.f32.mrf.mxu0 }
 0xf0e   :  { %v3260_v8 = vpop.f32.mrf.mxu1 }
 0xf0f   :  { %v2776_v29 = vadd.f32 %v3260_v8, %v3762_v9 }
 0xf10   :  { %v2766_v31 = vpop.f32.mrf.mxu1 }
 0xf11   :  { %2778 = vst.msk [vmem:[#allocation4 + $0x8] sm:$0xff] %vm83_vm0, %v2776_v29  ;;  %v2775_v32 = vadd.f32 %v2766_v31, %v3765_v43 }
 0xf13   :  { %2777 = vst.msk [vmem:[#allocation4] sm:$0xff] %vm83_vm0, %v2775_v32 }
 0xf14   :  { %3322 = shalt.err (!%p3319_p9)
}
 0xf15   :  { %s3339_s14 = smov 128   ;;  %s3340_s15 = smov 8  }
 0xf16   :  { %2790 = dma.vmem_to_hbm [thread:$0]  %s2785_s13, 256, %s3837_s12, [#allocation5], %s3339_s14, %s3339_s14, %s3340_s15  }
 0xf17   :  { %3333 = dma.done.wait [#allocation5], 256  }
 0xf18   :  { %3334 = vsyncadd [#allocation5], 4294967040 }
 0xf19   :  { %2794 = vsyncpa [#allocation5], 1 }

</bundles_post_ra>
